<compile_context>
chip_gen: v7x
topology: tpu7x:2x2x1
jax: 0.10.0
libtpu: 0.0.40
codegen_flags: <defaults>
</compile_context>

<pallas_src>
import functools
import math

import jax
import jax.numpy as jnp
from jax.experimental import pallas as pl
from jax.experimental.pallas import tpu as pltpu

# ----------------------- small-config ViT hyperparameters -----------------------
IMG = 32          # image spatial size (real ViT-B/16 uses 224)
PATCH = 16        # patch size (same as vit_b_16)
IN_CH = 3         # RGB
D = 64            # hidden dim (real: 768)
NUM_HEADS = 4     # (real: 12)
HEAD_DIM = D // NUM_HEADS
MLP = 4 * D       # (real: 3072)
NUM_LAYERS = 2    # (real: 12)
NUM_CLASSES = 10
N_PATCHES = (IMG // PATCH) ** 2
SEQ = N_PATCHES + 1          # 1 cls token + patches
SEQ_PAD = 8                  # per-batch row stride, padded to the 8-sublane tile
LN_EPS = 1e-6                # torchvision ViT uses eps=1e-6
HEAD_PAD = 128               # lane-dense classifier output width (sliced outside)


# ------------------------------ fused ViT kernel ---------------------------------
def _vit_kernel(
    # inputs (per-grid-step views)
    patches_ref, conv_w_ref, conv_b_ref, cls_ref, pos_ref, headsum_ref,
    ln1_g_ref, ln1_b_ref, qkv_w_ref, qkv_b_ref, out_w_ref, out_b_ref,
    ln2_g_ref, ln2_b_ref, fc1_w_ref, fc1_b_ref, fc2_w_ref, fc2_b_ref,
    lnf_g_ref, lnf_b_ref, head_w_ref, head_b_ref,
    # output
    logits_ref,
    # scratch (persists across grid steps)
    h_scr,
    *, batch, seq, seq_pad, num_heads, eps,
):
    l = pl.program_id(0)
    B, S, SP = batch, seq, seq_pad
    rows = B * SP
    d_model = pos_ref.shape[-1]
    dh = d_model // num_heads
    scale = 1.0 / math.sqrt(dh)

    def layer_norm(x, g, b):
        mu = jnp.mean(x, axis=-1, keepdims=True)
        var = jnp.mean(jnp.square(x - mu), axis=-1, keepdims=True)
        return (x - mu) * jax.lax.rsqrt(var + eps) * g + b

    # ---- patch embedding + [CLS] token + positional embedding (first step only) ----
    @pl.when(l == 0)
    def _():
        # single [B*SP, CPP] @ [CPP, D] matmul; cls/pad rows of `patches` are zero
        tok = jnp.dot(patches_ref[...], conv_w_ref[...],
                      preferred_element_type=jnp.float32)                 # [B*SP, D]
        # row position inside each batch block (0..SP-1), no per-batch loop
        seqpos = jax.lax.broadcasted_iota(jnp.int32, (B, SP, 1), 1).reshape(rows, 1)
        is_cls = (seqpos == 0).astype(jnp.float32)
        is_patch = jnp.logical_and(seqpos >= 1, seqpos < S).astype(jnp.float32)
        emb = tok + pos_ref[...]                                          # pos=0 on pad rows
        emb = emb + is_patch * conv_b_ref[...]
        emb = emb + is_cls * cls_ref[...]
        h_scr[...] = emb                                                  # pad rows stay 0

    h = h_scr[...]                                                        # [B*SP, D]

    # ------------------- multi-head self-attention block (pre-LN) -------------------
    y = layer_norm(h, ln1_g_ref[0], ln1_b_ref[0])
    q = jnp.dot(y, qkv_w_ref[0, 0], preferred_element_type=jnp.float32) + qkv_b_ref[0, 0]
    k = jnp.dot(y, qkv_w_ref[0, 1], preferred_element_type=jnp.float32) + qkv_b_ref[0, 1]
    v = jnp.dot(y, qkv_w_ref[0, 2], preferred_element_type=jnp.float32) + qkv_b_ref[0, 2]
    q3 = q.reshape(B, SP, d_model) * scale
    k3 = k.reshape(B, SP, d_model)
    v3 = v.reshape(B, SP, d_model)

    # lane-expanded scores: e[b,i,j,d] = q[b,i,d] * k[b,j,d]
    e = q3[:, :, None, :] * k3[:, None, :, :]                             # [B,SP,SP,D]
    # block-diagonal head-sum matmul replicates each head's score across its lanes
    s = jnp.dot(e.reshape(rows * SP, d_model), headsum_ref[...],
                preferred_element_type=jnp.float32).reshape(B, SP, SP, d_model)
    # additive key-padding mask (pad key rows j >= S never attended to)
    kpos = jax.lax.broadcasted_iota(jnp.int32, (SP, 1), 0).reshape(1, 1, SP, 1)
    s = s + jnp.where(kpos < S, 0.0, -1e30)
    # per-head softmax over keys (axis=2), replicated across each head's lanes
    m = jnp.max(s, axis=2, keepdims=True)
    p = jnp.exp(s - m)
    p = p / jnp.sum(p, axis=2, keepdims=True)
    # attention output in head-concat layout: ctx[b,i,d] = sum_j p[b,i,j,d] * v[b,j,d]
    ctx = jnp.sum(p * v3[:, None, :, :], axis=2)                          # [B,SP,D]
    attn = jnp.dot(ctx.reshape(rows, d_model), out_w_ref[0],
                   preferred_element_type=jnp.float32) + out_b_ref[0]
    h = h + attn                                                          # residual

    # ------------------------- MLP block (exact erf GELU) ---------------------------
    y2 = layer_norm(h, ln2_g_ref[0], ln2_b_ref[0])
    y2 = jnp.dot(y2, fc1_w_ref[0], preferred_element_type=jnp.float32) + fc1_b_ref[0]
    y2 = 0.5 * y2 * (1.0 + jax.lax.erf(y2 * (1.0 / math.sqrt(2.0))))
    y2 = jnp.dot(y2, fc2_w_ref[0], preferred_element_type=jnp.float32) + fc2_b_ref[0]
    h = h + y2                                                            # residual
    h_scr[...] = h

    # ---------- final LayerNorm + classifier head on cls rows (last step only) -------
    @pl.when(l == pl.num_programs(0) - 1)
    def _():
        cls_rows = h.reshape(B, SP, d_model)[:, :1, :].reshape(B, d_model)  # [B, D]
        hf = layer_norm(cls_rows, lnf_g_ref[...], lnf_b_ref[...])
        logits_ref[...] = (jnp.dot(hf, head_w_ref[...],
                                   preferred_element_type=jnp.float32)
                           + head_b_ref[...])                             # [B, 128]


# ------------------------------- forward pass ------------------------------------
def vit_forward(params, x):
    B, C, H, W = x.shape
    P = PATCH
    Hp, Wp = H // P, W // P
    N = Hp * Wp
    S = N + 1
    SP = SEQ_PAD
    CPP = C * P * P
    rows = B * SP
    lp = params["layers"]
    L = lp["qkv_w"].shape[0]

    # Conv2d(C, D, kernel=P, stride=P) == patchify + matmul.  Flatten each patch in
    # (c, kh, kw) order to match the conv weight layout [D, C, P, P].
    patches = x.reshape(B, C, Hp, P, Wp, P).transpose(0, 2, 4, 1, 3, 5).reshape(B, N, CPP)
    # pad each batch block to SP rows: row 0 = cls slot (zeros), rows 1..N = patches,
    # rows N+1..SP-1 = zero padding.  All layout plumbing, done outside the kernel.
    patches_pad = jnp.pad(patches, ((0, 0), (1, SP - S), (0, 0))).reshape(rows, CPP)

    # positional embedding tiled over batches with zero pad rows
    pos_tiled = jnp.tile(jnp.pad(params["pos_embed"], ((0, SP - S), (0, 0))), (B, 1))

    # block-diagonal "head-sum" matrix: headsum[d', d] = 1 iff d', d in the same head
    head_ids = jnp.arange(D) // HEAD_DIM
    headsum = (head_ids[:, None] == head_ids[None, :]).astype(jnp.float32)

    # classifier head padded to a lane-dense 128-wide output (zero cols, sliced off)
    head_w = jnp.pad(params["head_w"], ((0, 0), (0, HEAD_PAD - NUM_CLASSES)))
    head_b = jnp.pad(params["head_b"], (0, HEAD_PAD - NUM_CLASSES)).reshape(1, HEAD_PAD)

    args = (
        patches_pad, params["conv_w"], params["conv_b"], params["cls_token"], pos_tiled,
        headsum,
        lp["ln1_g"], lp["ln1_b"], lp["qkv_w"], lp["qkv_b"], lp["out_w"], lp["out_b"],
        lp["ln2_g"], lp["ln2_b"], lp["fc1_w"], lp["fc1_b"], lp["fc2_w"], lp["fc2_b"],
        params["ln_g"], params["ln_b"], head_w, head_b,
    )

    const2 = lambda shape: pl.BlockSpec(shape, lambda l: (0, 0))
    layer3 = lambda shape: pl.BlockSpec((1,) + shape, lambda l: (l, 0, 0))
    layer4 = lambda shape: pl.BlockSpec((1,) + shape, lambda l: (l, 0, 0, 0))

    in_specs = [
        const2((rows, CPP)),          # patches_pad
        const2((CPP, D)),             # conv_w
        const2((1, D)),               # conv_b
        const2((1, D)),               # cls_token
        const2((rows, D)),            # pos_tiled
        const2((D, D)),               # headsum
        layer3((1, D)),               # ln1_g
        layer3((1, D)),               # ln1_b
        layer4((3, D, D)),            # qkv_w
        layer4((3, 1, D)),            # qkv_b
        layer3((D, D)),               # out_w
        layer3((1, D)),               # out_b
        layer3((1, D)),               # ln2_g
        layer3((1, D)),               # ln2_b
        layer3((D, MLP)),             # fc1_w
        layer3((1, MLP)),             # fc1_b
        layer3((MLP, D)),             # fc2_w
        layer3((1, D)),               # fc2_b
        const2((1, D)),               # ln_g (final)
        const2((1, D)),               # ln_b (final)
        const2((D, HEAD_PAD)),        # head_w
        const2((1, HEAD_PAD)),        # head_b
    ]

    # rough cost hint for the XLA scheduler around the fused custom call
    per_layer_flops = (6 * rows * D * D            # q/k/v projections
                       + 2 * rows * SP * D         # q*k outer product
                       + 2 * rows * SP * D * D     # head-sum matmul
                       + 2 * rows * SP * D         # weighted V sum
                       + 2 * rows * D * D          # out projection
                       + 4 * rows * D * MLP)       # fc1 + fc2
    flops = 2 * rows * CPP * D + L * per_layer_flops + 2 * B * D * HEAD_PAD
    transcendentals = L * (rows * SP * D + rows * MLP)
    bytes_accessed = 4 * (sum(int(a.size) for a in args) + B * HEAD_PAD)

    logits_pad = pl.pallas_call(
        functools.partial(_vit_kernel, batch=B, seq=S, seq_pad=SP,
                          num_heads=NUM_HEADS, eps=LN_EPS),
        out_shape=jax.ShapeDtypeStruct((B, HEAD_PAD), jnp.float32),
        grid_spec=pltpu.PrefetchScalarGridSpec(
            num_scalar_prefetch=0,
            grid=(L,),
            in_specs=in_specs,
            out_specs=pl.BlockSpec((B, HEAD_PAD), lambda l: (0, 0)),
            scratch_shapes=[pltpu.VMEM((rows, D), jnp.float32)],   # persistent tokens
        ),
        compiler_params=pltpu.CompilerParams(dimension_semantics=("arbitrary",)),
        cost_estimate=pl.CostEstimate(flops=flops,
                                      transcendentals=transcendentals,
                                      bytes_accessed=bytes_accessed),
    )(*args)

    return logits_pad[:, :NUM_CLASSES]


# ------------------------------- parameter init ----------------------------------
def init_params(key, num_classes=NUM_CLASSES, num_layers=NUM_LAYERS):
    keys = iter(jax.random.split(key, 64))

    def nrm(shape, scale=0.02):
        return scale * jax.random.normal(next(keys), shape, dtype=jnp.float32)

    L = num_layers
    return {
        "conv_w": nrm((IN_CH * PATCH * PATCH, D)),   # conv_proj weight, flattened+transposed
        "conv_b": jnp.zeros((1, D), jnp.float32),
        "cls_token": nrm((1, D)),
        "pos_embed": nrm((SEQ, D)),
        "ln_g": jnp.ones((1, D), jnp.float32),
        "ln_b": jnp.zeros((1, D), jnp.float32),
        "head_w": nrm((D, num_classes)),
        "head_b": jnp.zeros((num_classes,), jnp.float32),
        # per-layer weights stacked on a leading layer axis (streamed via the grid)
        "layers": {
            "ln1_g": jnp.ones((L, 1, D), jnp.float32),
            "ln1_b": jnp.zeros((L, 1, D), jnp.float32),
            "qkv_w": nrm((L, 3, D, D)),              # [layer, {q,k,v}, in, out]
            "qkv_b": jnp.zeros((L, 3, 1, D), jnp.float32),
            "out_w": nrm((L, D, D)),
            "out_b": jnp.zeros((L, 1, D), jnp.float32),
            "ln2_g": jnp.ones((L, 1, D), jnp.float32),
            "ln2_b": jnp.zeros((L, 1, D), jnp.float32),
            "fc1_w": nrm((L, D, MLP)),
            "fc1_b": jnp.zeros((L, 1, MLP), jnp.float32),
            "fc2_w": nrm((L, MLP, D)),
            "fc2_b": jnp.zeros((L, 1, D), jnp.float32),
        },
    }


# ------------------------------------ main ----------------------------------------
if __name__ == "__main__":
    key = jax.random.PRNGKey(0)
    pkey, xkey = jax.random.split(key)
    params = init_params(pkey)

    # input: NCHW, like the PyTorch module (small spatial size for this test)
    x = jax.random.normal(xkey, (2, IN_CH, IMG, IMG), dtype=jnp.float32)

    logits = jax.jit(vit_forward)(params, x)
    jax.block_until_ready(logits)

    assert logits.shape == (2, NUM_CLASSES), logits.shape
    assert bool(jnp.all(jnp.isfinite(logits)))
    print("KERNEL_OK")
</pallas_src>

<mosaic_0001>
module attributes {stable_mosaic.version = 11 : i64} {
  func.func @_vit_kernel(%arg0: i32, %arg1: memref<16x768xf32, #tpu.memory_space<vmem>>, %arg2: memref<768x64xf32, #tpu.memory_space<vmem>>, %arg3: memref<1x64xf32, #tpu.memory_space<vmem>>, %arg4: memref<1x64xf32, #tpu.memory_space<vmem>>, %arg5: memref<16x64xf32, #tpu.memory_space<vmem>>, %arg6: memref<64x64xf32, #tpu.memory_space<vmem>>, %arg7: memref<1x1x64xf32, #tpu.memory_space<vmem>>, %arg8: memref<1x1x64xf32, #tpu.memory_space<vmem>>, %arg9: memref<1x3x64x64xf32, #tpu.memory_space<vmem>>, %arg10: memref<1x3x1x64xf32, #tpu.memory_space<vmem>>, %arg11: memref<1x64x64xf32, #tpu.memory_space<vmem>>, %arg12: memref<1x1x64xf32, #tpu.memory_space<vmem>>, %arg13: memref<1x1x64xf32, #tpu.memory_space<vmem>>, %arg14: memref<1x1x64xf32, #tpu.memory_space<vmem>>, %arg15: memref<1x64x256xf32, #tpu.memory_space<vmem>>, %arg16: memref<1x1x256xf32, #tpu.memory_space<vmem>>, %arg17: memref<1x256x64xf32, #tpu.memory_space<vmem>>, %arg18: memref<1x1x64xf32, #tpu.memory_space<vmem>>, %arg19: memref<1x64xf32, #tpu.memory_space<vmem>>, %arg20: memref<1x64xf32, #tpu.memory_space<vmem>>, %arg21: memref<64x128xf32, #tpu.memory_space<vmem>>, %arg22: memref<1x128xf32, #tpu.memory_space<vmem>>, %arg23: memref<2x128xf32, #tpu.memory_space<vmem>>, %arg24: memref<16x64xf32, #tpu.memory_space<vmem>>) attributes {dimension_semantics = [#tpu.dimension_semantics<arbitrary>], iteration_bounds = array<i64: 2>, scalar_prefetch = 0 : i64, scratch_operands = 1 : i64, tpu.core_type = #tpu.core_type<tc>, window_params = [{pipeline_mode = #tpu.pipeline_mode<synchronous>, transform_indices = @transform_0, window_bounds = array<i64: 16, 768>}, {pipeline_mode = #tpu.pipeline_mode<synchronous>, transform_indices = @transform_1, window_bounds = array<i64: 768, 64>}, {pipeline_mode = #tpu.pipeline_mode<synchronous>, transform_indices = @transform_2, window_bounds = array<i64: 1, 64>}, {pipeline_mode = #tpu.pipeline_mode<synchronous>, transform_indices = @transform_3, window_bounds = array<i64: 1, 64>}, {pipeline_mode = #tpu.pipeline_mode<synchronous>, transform_indices = @transform_4, window_bounds = array<i64: 16, 64>}, {pipeline_mode = #tpu.pipeline_mode<synchronous>, transform_indices = @transform_5, window_bounds = array<i64: 64, 64>}, {transform_indices = @transform_6, window_bounds = array<i64: 1, 1, 64>}, {transform_indices = @transform_7, window_bounds = array<i64: 1, 1, 64>}, {transform_indices = @transform_8, window_bounds = array<i64: 1, 3, 64, 64>}, {transform_indices = @transform_9, window_bounds = array<i64: 1, 3, 1, 64>}, {transform_indices = @transform_10, window_bounds = array<i64: 1, 64, 64>}, {transform_indices = @transform_11, window_bounds = array<i64: 1, 1, 64>}, {transform_indices = @transform_12, window_bounds = array<i64: 1, 1, 64>}, {transform_indices = @transform_13, window_bounds = array<i64: 1, 1, 64>}, {transform_indices = @transform_14, window_bounds = array<i64: 1, 64, 256>}, {transform_indices = @transform_15, window_bounds = array<i64: 1, 1, 256>}, {transform_indices = @transform_16, window_bounds = array<i64: 1, 256, 64>}, {transform_indices = @transform_17, window_bounds = array<i64: 1, 1, 64>}, {pipeline_mode = #tpu.pipeline_mode<synchronous>, transform_indices = @transform_18, window_bounds = array<i64: 1, 64>}, {pipeline_mode = #tpu.pipeline_mode<synchronous>, transform_indices = @transform_19, window_bounds = array<i64: 1, 64>}, {pipeline_mode = #tpu.pipeline_mode<synchronous>, transform_indices = @transform_20, window_bounds = array<i64: 64, 128>}, {pipeline_mode = #tpu.pipeline_mode<synchronous>, transform_indices = @transform_21, window_bounds = array<i64: 1, 128>}, {pipeline_mode = #tpu.pipeline_mode<synchronous>, transform_indices = @transform_22, window_bounds = array<i64: 2, 128>}]} {
    %c0_i32 = arith.constant 0 : i32
    %0 = arith.cmpi eq, %arg0, %c0_i32 : i32
    %1 = arith.extui %0 : i1 to i32
    %c0_i32_0 = arith.constant 0 : i32
    %2 = arith.cmpi ne, %1, %c0_i32_0 : i32
    scf.if %2 {
      %c0_84 = arith.constant 0 : index
      %c0_85 = arith.constant 0 : index
      %149 = vector.load %arg1[%c0_84, %c0_85] : memref<16x768xf32, #tpu.memory_space<vmem>>, vector<16x768xf32>
      %c0_86 = arith.constant 0 : index
      %c0_87 = arith.constant 0 : index
      %150 = vector.load %arg2[%c0_86, %c0_87] : memref<768x64xf32, #tpu.memory_space<vmem>>, vector<768x64xf32>
      %cst_88 = arith.constant dense<0.000000e+00> : vector<16x64xf32>
      %151 = tpu.matmul %149, %150, %cst_88 {dimension_numbers = #tpu.dot_dimension_numbers<[1], [0], [0], [1], [0, 0, 1, 1], [], []>} : vector<16x768xf32>, vector<768x64xf32>, vector<16x64xf32> -> vector<16x64xf32>
      %152 = tpu.iota {dimensions = array<i32: 1>} : vector<2x8x1xi32>
      %153 = vector.shape_cast %152 : vector<2x8x1xi32> to vector<16x1xi32>
      %c0_i32_89 = arith.constant 0 : i32
      %154 = vector.broadcast %c0_i32_89 : i32 to vector<16x1xi32>
      %155 = arith.cmpi eq, %153, %154 : vector<16x1xi32>
      %156 = arith.extui %155 : vector<16x1xi1> to vector<16x1xi32>
      %157 = arith.sitofp %156 : vector<16x1xi32> to vector<16x1xf32>
      %c1_i32_90 = arith.constant 1 : i32
      %158 = vector.broadcast %c1_i32_90 : i32 to vector<16x1xi32>
      %159 = arith.cmpi sge, %153, %158 : vector<16x1xi32>
      %c5_i32_91 = arith.constant 5 : i32
      %160 = vector.broadcast %c5_i32_91 : i32 to vector<16x1xi32>
      %161 = arith.cmpi slt, %153, %160 : vector<16x1xi32>
      %162 = arith.andi %159, %161 : vector<16x1xi1>
      %163 = arith.extui %162 : vector<16x1xi1> to vector<16x1xi32>
      %164 = arith.sitofp %163 : vector<16x1xi32> to vector<16x1xf32>
      %c0_92 = arith.constant 0 : index
      %c0_93 = arith.constant 0 : index
      %165 = vector.load %arg5[%c0_92, %c0_93] : memref<16x64xf32, #tpu.memory_space<vmem>>, vector<16x64xf32>
      %166 = arith.addf %151, %165 : vector<16x64xf32>
      %c0_94 = arith.constant 0 : index
      %c0_95 = arith.constant 0 : index
      %167 = vector.load %arg3[%c0_94, %c0_95] : memref<1x64xf32, #tpu.memory_space<vmem>>, vector<1x64xf32>
      %168 = vector.broadcast %164 : vector<16x1xf32> to vector<16x64xf32>
      %169 = vector.broadcast %167 : vector<1x64xf32> to vector<16x64xf32>
      %170 = arith.mulf %168, %169 : vector<16x64xf32>
      %171 = arith.addf %166, %170 : vector<16x64xf32>
      %c0_96 = arith.constant 0 : index
      %c0_97 = arith.constant 0 : index
      %172 = vector.load %arg4[%c0_96, %c0_97] : memref<1x64xf32, #tpu.memory_space<vmem>>, vector<1x64xf32>
      %173 = vector.broadcast %157 : vector<16x1xf32> to vector<16x64xf32>
      %174 = vector.broadcast %172 : vector<1x64xf32> to vector<16x64xf32>
      %175 = arith.mulf %173, %174 : vector<16x64xf32>
      %176 = arith.addf %171, %175 : vector<16x64xf32>
      %c0_98 = arith.constant 0 : index
      %c0_99 = arith.constant 0 : index
      %177 = vector.load %arg24[%c0_98, %c0_99] : memref<16x64xf32, #tpu.memory_space<vmem>>, vector<16x64xf32>
      tpu.vector_store %arg24[%c0_98, %c0_99], %176 {strides = array<i32>} : memref<16x64xf32, #tpu.memory_space<vmem>>, vector<16x64xf32>,
    } else {
    }
    %c0 = arith.constant 0 : index
    %c0_1 = arith.constant 0 : index
    %3 = vector.load %arg24[%c0, %c0_1] : memref<16x64xf32, #tpu.memory_space<vmem>>, vector<16x64xf32>
    %c0_2 = arith.constant 0 : index
    %c0_3 = arith.constant 0 : index
    %c0_4 = arith.constant 0 : index
    %4 = vector.load %arg7[%c0_2, %c0_3, %c0_4] : memref<1x1x64xf32, #tpu.memory_space<vmem>>, vector<1x1x64xf32>
    %5 = vector.shape_cast %4 : vector<1x1x64xf32> to vector<1x64xf32>
    %c0_5 = arith.constant 0 : index
    %c0_6 = arith.constant 0 : index
    %c0_7 = arith.constant 0 : index
    %6 = vector.load %arg8[%c0_5, %c0_6, %c0_7] : memref<1x1x64xf32, #tpu.memory_space<vmem>>, vector<1x1x64xf32>
    %7 = vector.shape_cast %6 : vector<1x1x64xf32> to vector<1x64xf32>
    %cst = arith.constant dense<0.000000e+00> : vector<16xf32>
    %8 = vector.multi_reduction <add>, %3, %cst [1] : vector<16x64xf32> to vector<16xf32>
    %9 = vector.shape_cast %8 : vector<16xf32> to vector<16x1xf32>
    %cst_8 = arith.constant 6.400000e+01 : f32
    %10 = vector.broadcast %cst_8 : f32 to vector<16x1xf32>
    %11 = arith.divf %9, %10 : vector<16x1xf32>
    %12 = vector.broadcast %11 : vector<16x1xf32> to vector<16x64xf32>
    %13 = arith.subf %3, %12 : vector<16x64xf32>
    %14 = arith.mulf %13, %13 : vector<16x64xf32>
    %cst_9 = arith.constant dense<0.000000e+00> : vector<16xf32>
    %15 = vector.multi_reduction <add>, %14, %cst_9 [1] : vector<16x64xf32> to vector<16xf32>
    %16 = vector.shape_cast %15 : vector<16xf32> to vector<16x1xf32>
    %cst_10 = arith.constant 6.400000e+01 : f32
    %17 = vector.broadcast %cst_10 : f32 to vector<16x1xf32>
    %18 = arith.divf %16, %17 : vector<16x1xf32>
    %19 = vector.broadcast %11 : vector<16x1xf32> to vector<16x64xf32>
    %20 = arith.subf %3, %19 : vector<16x64xf32>
    %cst_11 = arith.constant 9.99999997E-7 : f32
    %21 = vector.broadcast %cst_11 : f32 to vector<16x1xf32>
    %22 = arith.addf %18, %21 : vector<16x1xf32>
    %23 = math.rsqrt %22 : vector<16x1xf32>
    %24 = vector.broadcast %23 : vector<16x1xf32> to vector<16x64xf32>
    %25 = arith.mulf %20, %24 : vector<16x64xf32>
    %26 = vector.broadcast %5 : vector<1x64xf32> to vector<16x64xf32>
    %27 = arith.mulf %25, %26 : vector<16x64xf32>
    %28 = vector.broadcast %7 : vector<1x64xf32> to vector<16x64xf32>
    %29 = arith.addf %27, %28 : vector<16x64xf32>
    %c0_12 = arith.constant 0 : index
    %c0_13 = arith.constant 0 : index
    %c0_14 = arith.constant 0 : index
    %c0_15 = arith.constant 0 : index
    %30 = vector.load %arg9[%c0_12, %c0_13, %c0_14, %c0_15] : memref<1x3x64x64xf32, #tpu.memory_space<vmem>>, vector<1x1x64x64xf32>
    %31 = vector.shape_cast %30 : vector<1x1x64x64xf32> to vector<64x64xf32>
    %cst_16 = arith.constant dense<0.000000e+00> : vector<16x64xf32>
    %32 = tpu.matmul %29, %31, %cst_16 {dimension_numbers = #tpu.dot_dimension_numbers<[1], [0], [0], [1], [0, 0, 1, 1], [], []>} : vector<16x64xf32>, vector<64x64xf32>, vector<16x64xf32> -> vector<16x64xf32>
    %c0_17 = arith.constant 0 : index
    %c0_18 = arith.constant 0 : index
    %c0_19 = arith.constant 0 : index
    %c0_20 = arith.constant 0 : index
    %33 = vector.load %arg10[%c0_17, %c0_18, %c0_19, %c0_20] : memref<1x3x1x64xf32, #tpu.memory_space<vmem>>, vector<1x1x1x64xf32>
    %34 = vector.shape_cast %33 : vector<1x1x1x64xf32> to vector<1x64xf32>
    %35 = vector.broadcast %34 : vector<1x64xf32> to vector<16x64xf32>
    %36 = arith.addf %32, %35 : vector<16x64xf32>
    %c0_21 = arith.constant 0 : index
    %c1 = arith.constant 1 : index
    %c0_22 = arith.constant 0 : index
    %c0_23 = arith.constant 0 : index
    %37 = vector.load %arg9[%c0_21, %c1, %c0_22, %c0_23] : memref<1x3x64x64xf32, #tpu.memory_space<vmem>>, vector<1x1x64x64xf32>
    %38 = vector.shape_cast %37 : vector<1x1x64x64xf32> to vector<64x64xf32>
    %cst_24 = arith.constant dense<0.000000e+00> : vector<16x64xf32>
    %39 = tpu.matmul %29, %38, %cst_24 {dimension_numbers = #tpu.dot_dimension_numbers<[1], [0], [0], [1], [0, 0, 1, 1], [], []>} : vector<16x64xf32>, vector<64x64xf32>, vector<16x64xf32> -> vector<16x64xf32>
    %c0_25 = arith.constant 0 : index
    %c1_26 = arith.constant 1 : index
    %c0_27 = arith.constant 0 : index
    %c0_28 = arith.constant 0 : index
    %40 = vector.load %arg10[%c0_25, %c1_26, %c0_27, %c0_28] : memref<1x3x1x64xf32, #tpu.memory_space<vmem>>, vector<1x1x1x64xf32>
    %41 = vector.shape_cast %40 : vector<1x1x1x64xf32> to vector<1x64xf32>
    %42 = vector.broadcast %41 : vector<1x64xf32> to vector<16x64xf32>
    %43 = arith.addf %39, %42 : vector<16x64xf32>
    %c0_29 = arith.constant 0 : index
    %c2 = arith.constant 2 : index
    %c0_30 = arith.constant 0 : index
    %c0_31 = arith.constant 0 : index
    %44 = vector.load %arg9[%c0_29, %c2, %c0_30, %c0_31] : memref<1x3x64x64xf32, #tpu.memory_space<vmem>>, vector<1x1x64x64xf32>
    %45 = vector.shape_cast %44 : vector<1x1x64x64xf32> to vector<64x64xf32>
    %cst_32 = arith.constant dense<0.000000e+00> : vector<16x64xf32>
    %46 = tpu.matmul %29, %45, %cst_32 {dimension_numbers = #tpu.dot_dimension_numbers<[1], [0], [0], [1], [0, 0, 1, 1], [], []>} : vector<16x64xf32>, vector<64x64xf32>, vector<16x64xf32> -> vector<16x64xf32>
    %c0_33 = arith.constant 0 : index
    %c2_34 = arith.constant 2 : index
    %c0_35 = arith.constant 0 : index
    %c0_36 = arith.constant 0 : index
    %47 = vector.load %arg10[%c0_33, %c2_34, %c0_35, %c0_36] : memref<1x3x1x64xf32, #tpu.memory_space<vmem>>, vector<1x1x1x64xf32>
    %48 = vector.shape_cast %47 : vector<1x1x1x64xf32> to vector<1x64xf32>
    %49 = vector.broadcast %48 : vector<1x64xf32> to vector<16x64xf32>
    %50 = arith.addf %46, %49 : vector<16x64xf32>
    %51 = vector.shape_cast %36 : vector<16x64xf32> to vector<2x8x64xf32>
    %cst_37 = arith.constant 2.500000e-01 : f32
    %52 = vector.broadcast %cst_37 : f32 to vector<2x8x64xf32>
    %53 = arith.mulf %51, %52 : vector<2x8x64xf32>
    %54 = vector.shape_cast %43 : vector<16x64xf32> to vector<2x8x64xf32>
    %55 = vector.shape_cast %50 : vector<16x64xf32> to vector<2x8x64xf32>
    %56 = vector.shape_cast %53 : vector<2x8x64xf32> to vector<2x8x1x64xf32>
    %57 = vector.shape_cast %54 : vector<2x8x64xf32> to vector<2x1x8x64xf32>
    %58 = vector.broadcast %56 : vector<2x8x1x64xf32> to vector<2x8x8x64xf32>
    %59 = vector.broadcast %57 : vector<2x1x8x64xf32> to vector<2x8x8x64xf32>
    %60 = arith.mulf %58, %59 : vector<2x8x8x64xf32>
    %61 = vector.shape_cast %60 : vector<2x8x8x64xf32> to vector<128x64xf32>
    %c0_38 = arith.constant 0 : index
    %c0_39 = arith.constant 0 : index
    %62 = vector.load %arg6[%c0_38, %c0_39] : memref<64x64xf32, #tpu.memory_space<vmem>>, vector<64x64xf32>
    %cst_40 = arith.constant dense<0.000000e+00> : vector<128x64xf32>
    %63 = tpu.matmul %61, %62, %cst_40 {dimension_numbers = #tpu.dot_dimension_numbers<[1], [0], [0], [1], [0, 0, 1, 1], [], []>} : vector<128x64xf32>, vector<64x64xf32>, vector<128x64xf32> -> vector<128x64xf32>
    %64 = vector.shape_cast %63 : vector<128x64xf32> to vector<2x8x8x64xf32>
    %65 = tpu.iota {dimensions = array<i32: 0>} : vector<8x1xi32>
    %66 = vector.shape_cast %65 : vector<8x1xi32> to vector<1x1x8x1xi32>
    %c5_i32 = arith.constant 5 : i32
    %67 = vector.broadcast %c5_i32 : i32 to vector<1x1x8x1xi32>
    %68 = arith.cmpi slt, %66, %67 : vector<1x1x8x1xi32>
    %cst_41 = arith.constant 0.000000e+00 : f32
    %cst_42 = arith.constant -1.000000e+30 : f32
    %69 = vector.broadcast %cst_41 : f32 to vector<1x1x8x1xf32>
    %70 = vector.broadcast %cst_42 : f32 to vector<1x1x8x1xf32>
    %71 = arith.select %68, %69, %70 : vector<1x1x8x1xi1>, vector<1x1x8x1xf32>
    %72 = vector.broadcast %71 : vector<1x1x8x1xf32> to vector<2x8x8x64xf32>
    %73 = arith.addf %64, %72 : vector<2x8x8x64xf32>
    %cst_43 = arith.constant dense<0xFF800000> : vector<2x8x64xf32>
    %74 = vector.multi_reduction <maximumf>, %73, %cst_43 [2] : vector<2x8x8x64xf32> to vector<2x8x64xf32>
    %75 = vector.shape_cast %74 : vector<2x8x64xf32> to vector<2x8x1x64xf32>
    %76 = vector.broadcast %75 : vector<2x8x1x64xf32> to vector<2x8x8x64xf32>
    %77 = arith.subf %73, %76 : vector<2x8x8x64xf32>
    %78 = math.exp %77 : vector<2x8x8x64xf32>
    %cst_44 = arith.constant dense<0.000000e+00> : vector<2x8x64xf32>
    %79 = vector.multi_reduction <add>, %78, %cst_44 [2] : vector<2x8x8x64xf32> to vector<2x8x64xf32>
    %80 = vector.shape_cast %79 : vector<2x8x64xf32> to vector<2x8x1x64xf32>
    %81 = vector.broadcast %80 : vector<2x8x1x64xf32> to vector<2x8x8x64xf32>
    %82 = arith.divf %78, %81 : vector<2x8x8x64xf32>
    %83 = vector.shape_cast %55 : vector<2x8x64xf32> to vector<2x1x8x64xf32>
    %84 = vector.broadcast %83 : vector<2x1x8x64xf32> to vector<2x8x8x64xf32>
    %85 = arith.mulf %82, %84 : vector<2x8x8x64xf32>
    %cst_45 = arith.constant dense<0.000000e+00> : vector<2x8x64xf32>
    %86 = vector.multi_reduction <add>, %85, %cst_45 [2] : vector<2x8x8x64xf32> to vector<2x8x64xf32>
    %87 = vector.shape_cast %86 : vector<2x8x64xf32> to vector<16x64xf32>
    %c0_46 = arith.constant 0 : index
    %c0_47 = arith.constant 0 : index
    %c0_48 = arith.constant 0 : index
    %88 = vector.load %arg11[%c0_46, %c0_47, %c0_48] : memref<1x64x64xf32, #tpu.memory_space<vmem>>, vector<1x64x64xf32>
    %89 = vector.shape_cast %88 : vector<1x64x64xf32> to vector<64x64xf32>
    %cst_49 = arith.constant dense<0.000000e+00> : vector<16x64xf32>
    %90 = tpu.matmul %87, %89, %cst_49 {dimension_numbers = #tpu.dot_dimension_numbers<[1], [0], [0], [1], [0, 0, 1, 1], [], []>} : vector<16x64xf32>, vector<64x64xf32>, vector<16x64xf32> -> vector<16x64xf32>
    %c0_50 = arith.constant 0 : index
    %c0_51 = arith.constant 0 : index
    %c0_52 = arith.constant 0 : index
    %91 = vector.load %arg12[%c0_50, %c0_51, %c0_52] : memref<1x1x64xf32, #tpu.memory_space<vmem>>, vector<1x1x64xf32>
    %92 = vector.shape_cast %91 : vector<1x1x64xf32> to vector<1x64xf32>
    %93 = vector.broadcast %92 : vector<1x64xf32> to vector<16x64xf32>
    %94 = arith.addf %90, %93 : vector<16x64xf32>
    %95 = arith.addf %3, %94 : vector<16x64xf32>
    %c0_53 = arith.constant 0 : index
    %c0_54 = arith.constant 0 : index
    %c0_55 = arith.constant 0 : index
    %96 = vector.load %arg13[%c0_53, %c0_54, %c0_55] : memref<1x1x64xf32, #tpu.memory_space<vmem>>, vector<1x1x64xf32>
    %97 = vector.shape_cast %96 : vector<1x1x64xf32> to vector<1x64xf32>
    %c0_56 = arith.constant 0 : index
    %c0_57 = arith.constant 0 : index
    %c0_58 = arith.constant 0 : index
    %98 = vector.load %arg14[%c0_56, %c0_57, %c0_58] : memref<1x1x64xf32, #tpu.memory_space<vmem>>, vector<1x1x64xf32>
    %99 = vector.shape_cast %98 : vector<1x1x64xf32> to vector<1x64xf32>
    %cst_59 = arith.constant dense<0.000000e+00> : vector<16xf32>
    %100 = vector.multi_reduction <add>, %95, %cst_59 [1] : vector<16x64xf32> to vector<16xf32>
    %101 = vector.shape_cast %100 : vector<16xf32> to vector<16x1xf32>
    %cst_60 = arith.constant 6.400000e+01 : f32
    %102 = vector.broadcast %cst_60 : f32 to vector<16x1xf32>
    %103 = arith.divf %101, %102 : vector<16x1xf32>
    %104 = vector.broadcast %103 : vector<16x1xf32> to vector<16x64xf32>
    %105 = arith.subf %95, %104 : vector<16x64xf32>
    %106 = arith.mulf %105, %105 : vector<16x64xf32>
    %cst_61 = arith.constant dense<0.000000e+00> : vector<16xf32>
    %107 = vector.multi_reduction <add>, %106, %cst_61 [1] : vector<16x64xf32> to vector<16xf32>
    %108 = vector.shape_cast %107 : vector<16xf32> to vector<16x1xf32>
    %cst_62 = arith.constant 6.400000e+01 : f32
    %109 = vector.broadcast %cst_62 : f32 to vector<16x1xf32>
    %110 = arith.divf %108, %109 : vector<16x1xf32>
    %111 = vector.broadcast %103 : vector<16x1xf32> to vector<16x64xf32>
    %112 = arith.subf %95, %111 : vector<16x64xf32>
    %cst_63 = arith.constant 9.99999997E-7 : f32
    %113 = vector.broadcast %cst_63 : f32 to vector<16x1xf32>
    %114 = arith.addf %110, %113 : vector<16x1xf32>
    %115 = math.rsqrt %114 : vector<16x1xf32>
    %116 = vector.broadcast %115 : vector<16x1xf32> to vector<16x64xf32>
    %117 = arith.mulf %112, %116 : vector<16x64xf32>
    %118 = vector.broadcast %97 : vector<1x64xf32> to vector<16x64xf32>
    %119 = arith.mulf %117, %118 : vector<16x64xf32>
    %120 = vector.broadcast %99 : vector<1x64xf32> to vector<16x64xf32>
    %121 = arith.addf %119, %120 : vector<16x64xf32>
    %c0_64 = arith.constant 0 : index
    %c0_65 = arith.constant 0 : index
    %c0_66 = arith.constant 0 : index
    %122 = vector.load %arg15[%c0_64, %c0_65, %c0_66] : memref<1x64x256xf32, #tpu.memory_space<vmem>>, vector<1x64x256xf32>
    %123 = vector.shape_cast %122 : vector<1x64x256xf32> to vector<64x256xf32>
    %cst_67 = arith.constant dense<0.000000e+00> : vector<16x256xf32>
    %124 = tpu.matmul %121, %123, %cst_67 {dimension_numbers = #tpu.dot_dimension_numbers<[1], [0], [0], [1], [0, 0, 1, 1], [], []>} : vector<16x64xf32>, vector<64x256xf32>, vector<16x256xf32> -> vector<16x256xf32>
    %c0_68 = arith.constant 0 : index
    %c0_69 = arith.constant 0 : index
    %c0_70 = arith.constant 0 : index
    %125 = vector.load %arg16[%c0_68, %c0_69, %c0_70] : memref<1x1x256xf32, #tpu.memory_space<vmem>>, vector<1x1x256xf32>
    %126 = vector.shape_cast %125 : vector<1x1x256xf32> to vector<1x256xf32>
    %127 = vector.broadcast %126 : vector<1x256xf32> to vector<16x256xf32>
    %128 = arith.addf %124, %127 : vector<16x256xf32>
    %cst_71 = arith.constant 5.000000e-01 : f32
    %129 = vector.broadcast %cst_71 : f32 to vector<16x256xf32>
    %130 = arith.mulf %129, %128 : vector<16x256xf32>
    %cst_72 = arith.constant 0.707106769 : f32
    %131 = vector.broadcast %cst_72 : f32 to vector<16x256xf32>
    %132 = arith.mulf %128, %131 : vector<16x256xf32>
    %133 = math.erf %132 : vector<16x256xf32>
    %cst_73 = arith.constant 1.000000e+00 : f32
    %134 = vector.broadcast %cst_73 : f32 to vector<16x256xf32>
    %135 = arith.addf %134, %133 : vector<16x256xf32>
    %136 = arith.mulf %130, %135 : vector<16x256xf32>
    %c0_74 = arith.constant 0 : index
    %c0_75 = arith.constant 0 : index
    %c0_76 = arith.constant 0 : index
    %137 = vector.load %arg17[%c0_74, %c0_75, %c0_76] : memref<1x256x64xf32, #tpu.memory_space<vmem>>, vector<1x256x64xf32>
    %138 = vector.shape_cast %137 : vector<1x256x64xf32> to vector<256x64xf32>
    %cst_77 = arith.constant dense<0.000000e+00> : vector<16x64xf32>
    %139 = tpu.matmul %136, %138, %cst_77 {dimension_numbers = #tpu.dot_dimension_numbers<[1], [0], [0], [1], [0, 0, 1, 1], [], []>} : vector<16x256xf32>, vector<256x64xf32>, vector<16x64xf32> -> vector<16x64xf32>
    %c0_78 = arith.constant 0 : index
    %c0_79 = arith.constant 0 : index
    %c0_80 = arith.constant 0 : index
    %140 = vector.load %arg18[%c0_78, %c0_79, %c0_80] : memref<1x1x64xf32, #tpu.memory_space<vmem>>, vector<1x1x64xf32>
    %141 = vector.shape_cast %140 : vector<1x1x64xf32> to vector<1x64xf32>
    %142 = vector.broadcast %141 : vector<1x64xf32> to vector<16x64xf32>
    %143 = arith.addf %139, %142 : vector<16x64xf32>
    %144 = arith.addf %95, %143 : vector<16x64xf32>
    %c0_81 = arith.constant 0 : index
    %c0_82 = arith.constant 0 : index
    %145 = vector.load %arg24[%c0_81, %c0_82] : memref<16x64xf32, #tpu.memory_space<vmem>>, vector<16x64xf32>
    tpu.vector_store %arg24[%c0_81, %c0_82], %144 {strides = array<i32>} : memref<16x64xf32, #tpu.memory_space<vmem>>, vector<16x64xf32>,
    %c1_i32 = arith.constant 1 : i32
    %146 = arith.cmpi eq, %arg0, %c1_i32 : i32
    %147 = arith.extui %146 : i1 to i32
    %c0_i32_83 = arith.constant 0 : i32
    %148 = arith.cmpi ne, %147, %c0_i32_83 : i32
    scf.if %148 {
      %149 = vector.shape_cast %144 : vector<16x64xf32> to vector<2x8x64xf32>
      %150 = vector.extract_strided_slice %149 {offsets = [0, 0, 0], sizes = [2, 1, 64], strides = [1, 1, 1]} : vector<2x8x64xf32> to vector<2x1x64xf32>
      %151 = vector.shape_cast %150 : vector<2x1x64xf32> to vector<2x64xf32>
      %c0_84 = arith.constant 0 : index
      %c0_85 = arith.constant 0 : index
      %152 = vector.load %arg19[%c0_84, %c0_85] : memref<1x64xf32, #tpu.memory_space<vmem>>, vector<1x64xf32>
      %c0_86 = arith.constant 0 : index
      %c0_87 = arith.constant 0 : index
      %153 = vector.load %arg20[%c0_86, %c0_87] : memref<1x64xf32, #tpu.memory_space<vmem>>, vector<1x64xf32>
      %cst_88 = arith.constant dense<0.000000e+00> : vector<2xf32>
      %154 = vector.multi_reduction <add>, %151, %cst_88 [1] : vector<2x64xf32> to vector<2xf32>
      %155 = vector.shape_cast %154 : vector<2xf32> to vector<2x1xf32>
      %cst_89 = arith.constant 6.400000e+01 : f32
      %156 = vector.broadcast %cst_89 : f32 to vector<2x1xf32>
      %157 = arith.divf %155, %156 : vector<2x1xf32>
      %158 = vector.broadcast %157 : vector<2x1xf32> to vector<2x64xf32>
      %159 = arith.subf %151, %158 : vector<2x64xf32>
      %160 = arith.mulf %159, %159 : vector<2x64xf32>
      %cst_90 = arith.constant dense<0.000000e+00> : vector<2xf32>
      %161 = vector.multi_reduction <add>, %160, %cst_90 [1] : vector<2x64xf32> to vector<2xf32>
      %162 = vector.shape_cast %161 : vector<2xf32> to vector<2x1xf32>
      %cst_91 = arith.constant 6.400000e+01 : f32
      %163 = vector.broadcast %cst_91 : f32 to vector<2x1xf32>
      %164 = arith.divf %162, %163 : vector<2x1xf32>
      %165 = vector.broadcast %157 : vector<2x1xf32> to vector<2x64xf32>
      %166 = arith.subf %151, %165 : vector<2x64xf32>
      %cst_92 = arith.constant 9.99999997E-7 : f32
      %167 = vector.broadcast %cst_92 : f32 to vector<2x1xf32>
      %168 = arith.addf %164, %167 : vector<2x1xf32>
      %169 = math.rsqrt %168 : vector<2x1xf32>
      %170 = vector.broadcast %169 : vector<2x1xf32> to vector<2x64xf32>
      %171 = arith.mulf %166, %170 : vector<2x64xf32>
      %172 = vector.broadcast %152 : vector<1x64xf32> to vector<2x64xf32>
      %173 = arith.mulf %171, %172 : vector<2x64xf32>
      %174 = vector.broadcast %153 : vector<1x64xf32> to vector<2x64xf32>
      %175 = arith.addf %173, %174 : vector<2x64xf32>
      %c0_93 = arith.constant 0 : index
      %c0_94 = arith.constant 0 : index
      %176 = vector.load %arg21[%c0_93, %c0_94] : memref<64x128xf32, #tpu.memory_space<vmem>>, vector<64x128xf32>
      %cst_95 = arith.constant dense<0.000000e+00> : vector<2x128xf32>
      %177 = tpu.matmul %175, %176, %cst_95 {dimension_numbers = #tpu.dot_dimension_numbers<[1], [0], [0], [1], [0, 0, 1, 1], [], []>} : vector<2x64xf32>, vector<64x128xf32>, vector<2x128xf32> -> vector<2x128xf32>
      %c0_96 = arith.constant 0 : index
      %c0_97 = arith.constant 0 : index
      %178 = vector.load %arg22[%c0_96, %c0_97] : memref<1x128xf32, #tpu.memory_space<vmem>>, vector<1x128xf32>
      %179 = vector.broadcast %178 : vector<1x128xf32> to vector<2x128xf32>
      %180 = arith.addf %177, %179 : vector<2x128xf32>
      %c0_98 = arith.constant 0 : index
      %c0_99 = arith.constant 0 : index
      %181 = vector.load %arg23[%c0_98, %c0_99] : memref<2x128xf32, #tpu.memory_space<vmem>>, vector<2x128xf32>
      tpu.vector_store %arg23[%c0_98, %c0_99], %180 {strides = array<i32>} : memref<2x128xf32, #tpu.memory_space<vmem>>, vector<2x128xf32>,
    } else {
    }
    return
  }
  func.func @transform_0(%arg0: i32) -> (i32, i32) {
    %c0_i32 = arith.constant 0 : i32
    %c0_i32_0 = arith.constant 0 : i32
    %c0_i32_1 = arith.constant 0 : i32
    return %c0_i32, %c0_i32_0 : i32, i32
  }
  func.func @transform_1(%arg0: i32) -> (i32, i32) {
    %c0_i32 = arith.constant 0 : i32
    %c0_i32_0 = arith.constant 0 : i32
    %c0_i32_1 = arith.constant 0 : i32
    return %c0_i32, %c0_i32_0 : i32, i32
  }
  func.func @transform_2(%arg0: i32) -> (i32, i32) {
    %c0_i32 = arith.constant 0 : i32
    %c0_i32_0 = arith.constant 0 : i32
    %c0_i32_1 = arith.constant 0 : i32
    return %c0_i32, %c0_i32_0 : i32, i32
  }
  func.func @transform_3(%arg0: i32) -> (i32, i32) {
    %c0_i32 = arith.constant 0 : i32
    %c0_i32_0 = arith.constant 0 : i32
    %c0_i32_1 = arith.constant 0 : i32
    return %c0_i32, %c0_i32_0 : i32, i32
  }
  func.func @transform_4(%arg0: i32) -> (i32, i32) {
    %c0_i32 = arith.constant 0 : i32
    %c0_i32_0 = arith.constant 0 : i32
    %c0_i32_1 = arith.constant 0 : i32
    return %c0_i32, %c0_i32_0 : i32, i32
  }
  func.func @transform_5(%arg0: i32) -> (i32, i32) {
    %c0_i32 = arith.constant 0 : i32
    %c0_i32_0 = arith.constant 0 : i32
    %c0_i32_1 = arith.constant 0 : i32
    return %c0_i32, %c0_i32_0 : i32, i32
  }
  func.func @transform_6(%arg0: i32) -> (i32, i32, i32) {
    %c0_i32 = arith.constant 0 : i32
    %c0_i32_0 = arith.constant 0 : i32
    %c0_i32_1 = arith.constant 0 : i32
    return %arg0, %c0_i32, %c0_i32_0 : i32, i32, i32
  }
  func.func @transform_7(%arg0: i32) -> (i32, i32, i32) {
    %c0_i32 = arith.constant 0 : i32
    %c0_i32_0 = arith.constant 0 : i32
    %c0_i32_1 = arith.constant 0 : i32
    return %arg0, %c0_i32, %c0_i32_0 : i32, i32, i32
  }
  func.func @transform_8(%arg0: i32) -> (i32, i32, i32, i32) {
    %c0_i32 = arith.constant 0 : i32
    %c0_i32_0 = arith.constant 0 : i32
    %c0_i32_1 = arith.constant 0 : i32
    %c0_i32_2 = arith.constant 0 : i32
    return %arg0, %c0_i32, %c0_i32_0, %c0_i32_1 : i32, i32, i32, i32
  }
  func.func @transform_9(%arg0: i32) -> (i32, i32, i32, i32) {
    %c0_i32 = arith.constant 0 : i32
    %c0_i32_0 = arith.constant 0 : i32
    %c0_i32_1 = arith.constant 0 : i32
    %c0_i32_2 = arith.constant 0 : i32
    return %arg0, %c0_i32, %c0_i32_0, %c0_i32_1 : i32, i32, i32, i32
  }
  func.func @transform_10(%arg0: i32) -> (i32, i32, i32) {
    %c0_i32 = arith.constant 0 : i32
    %c0_i32_0 = arith.constant 0 : i32
    %c0_i32_1 = arith.constant 0 : i32
    return %arg0, %c0_i32, %c0_i32_0 : i32, i32, i32
  }
  func.func @transform_11(%arg0: i32) -> (i32, i32, i32) {
    %c0_i32 = arith.constant 0 : i32
    %c0_i32_0 = arith.constant 0 : i32
    %c0_i32_1 = arith.constant 0 : i32
    return %arg0, %c0_i32, %c0_i32_0 : i32, i32, i32
  }
  func.func @transform_12(%arg0: i32) -> (i32, i32, i32) {
    %c0_i32 = arith.constant 0 : i32
    %c0_i32_0 = arith.constant 0 : i32
    %c0_i32_1 = arith.constant 0 : i32
    return %arg0, %c0_i32, %c0_i32_0 : i32, i32, i32
  }
  func.func @transform_13(%arg0: i32) -> (i32, i32, i32) {
    %c0_i32 = arith.constant 0 : i32
    %c0_i32_0 = arith.constant 0 : i32
    %c0_i32_1 = arith.constant 0 : i32
    return %arg0, %c0_i32, %c0_i32_0 : i32, i32, i32
  }
  func.func @transform_14(%arg0: i32) -> (i32, i32, i32) {
    %c0_i32 = arith.constant 0 : i32
    %c0_i32_0 = arith.constant 0 : i32
    %c0_i32_1 = arith.constant 0 : i32
    return %arg0, %c0_i32, %c0_i32_0 : i32, i32, i32
  }
  func.func @transform_15(%arg0: i32) -> (i32, i32, i32) {
    %c0_i32 = arith.constant 0 : i32
    %c0_i32_0 = arith.constant 0 : i32
    %c0_i32_1 = arith.constant 0 : i32
    return %arg0, %c0_i32, %c0_i32_0 : i32, i32, i32
  }
  func.func @transform_16(%arg0: i32) -> (i32, i32, i32) {
    %c0_i32 = arith.constant 0 : i32
    %c0_i32_0 = arith.constant 0 : i32
    %c0_i32_1 = arith.constant 0 : i32
    return %arg0, %c0_i32, %c0_i32_0 : i32, i32, i32
  }
  func.func @transform_17(%arg0: i32) -> (i32, i32, i32) {
    %c0_i32 = arith.constant 0 : i32
    %c0_i32_0 = arith.constant 0 : i32
    %c0_i32_1 = arith.constant 0 : i32
    return %arg0, %c0_i32, %c0_i32_0 : i32, i32, i32
  }
  func.func @transform_18(%arg0: i32) -> (i32, i32) {
    %c0_i32 = arith.constant 0 : i32
    %c0_i32_0 = arith.constant 0 : i32
    %c0_i32_1 = arith.constant 0 : i32
    return %c0_i32, %c0_i32_0 : i32, i32
  }
  func.func @transform_19(%arg0: i32) -> (i32, i32) {
    %c0_i32 = arith.constant 0 : i32
    %c0_i32_0 = arith.constant 0 : i32
    %c0_i32_1 = arith.constant 0 : i32
    return %c0_i32, %c0_i32_0 : i32, i32
  }
  func.func @transform_20(%arg0: i32) -> (i32, i32) {
    %c0_i32 = arith.constant 0 : i32
    %c0_i32_0 = arith.constant 0 : i32
    %c0_i32_1 = arith.constant 0 : i32
    return %c0_i32, %c0_i32_0 : i32, i32
  }
  func.func @transform_21(%arg0: i32) -> (i32, i32) {
    %c0_i32 = arith.constant 0 : i32
    %c0_i32_0 = arith.constant 0 : i32
    %c0_i32_1 = arith.constant 0 : i32
    return %c0_i32, %c0_i32_0 : i32, i32
  }
  func.func @transform_22(%arg0: i32) -> (i32, i32) {
    %c0_i32 = arith.constant 0 : i32
    %c0_i32_0 = arith.constant 0 : i32
    %c0_i32_1 = arith.constant 0 : i32
    return %c0_i32, %c0_i32_0 : i32, i32
  }
}

</mosaic_0001>

<bundles_post_ra>
// kernel: vit_forward.1
= control target key start
LH: loop header
LB: loop body
LE: loop exit
PB: predicated region body
PF: predicated region fallthrough
CT: control target
= control target key end

     0   :  { %s5074_s0 = inlined_call_operand.vmem [shape: f32[16,768], index: 0, kind: input, shape index: {}]   ;;  %s5075_s1 = inlined_call_operand.vmem [shape: f32[768,64], index: 1, kind: input, shape index: {}]   ;;  %s5076_s2 = inlined_call_operand.vmem [shape: f32[1,64], index: 2, kind: input, shape index: {}]   ;;  %s5077_s3 = inlined_call_operand.vmem [shape: f32[1,64], index: 3, kind: input, shape index: {}]   ;;  %s5078_s4 = inlined_call_operand.vmem [shape: f32[16,64], index: 4, kind: input, shape index: {}]   ;;  %s5079_s5 = inlined_call_operand.vmem [shape: f32[64,64], index: 5, kind: input, shape index: {}]   ;;  %s5080_s6 = inlined_call_operand.vmem [shape: f32[2,1,64], index: 6, kind: input, shape index: {}]   ;;  %s5081_s7 = inlined_call_operand.vmem [shape: f32[2,1,64], index: 7, kind: input, shape index: {}]   ;;  %s5082_s8 = inlined_call_operand.vmem [shape: f32[2,3,64,64], index: 8, kind: input, shape index: {}]   ;;  %s5083_s9 = inlined_call_operand.vmem [shape: f32[2,3,1,64], index: 9, kind: input, shape index: {}]   ;;  %s5084_s10 = inlined_call_operand.vmem [shape: f32[2,64,64], index: 10, kind: input, shape index: {}]   ;;  %s5085_s11 = inlined_call_operand.vmem [shape: f32[2,1,64], index: 11, kind: input, shape index: {}]   ;;  %s5086_s12 = inlined_call_operand.vmem [shape: f32[2,1,64], index: 12, kind: input, shape index: {}]   ;;  %s5087_s13 = inlined_call_operand.vmem [shape: f32[2,1,64], index: 13, kind: input, shape index: {}]   ;;  %s5088_s14 = inlined_call_operand.vmem [shape: f32[2,64,256], index: 14, kind: input, shape index: {}]   ;;  %s5089_s15 = inlined_call_operand.vmem [shape: f32[2,1,256], index: 15, kind: input, shape index: {}]   ;;  %s5090_s16 = inlined_call_operand.vmem [shape: f32[2,256,64], index: 16, kind: input, shape index: {}]   ;;  %s5091_s17 = inlined_call_operand.vmem [shape: f32[2,1,64], index: 17, kind: input, shape index: {}]   ;;  %s5092_s18 = inlined_call_operand.vmem [shape: f32[1,64], index: 18, kind: input, shape index: {}]   ;;  %s5093_s19 = inlined_call_operand.vmem [shape: f32[1,64], index: 19, kind: input, shape index: {}]   ;;  %s5094_s20 = inlined_call_operand.vmem [shape: f32[64,128], index: 20, kind: input, shape index: {}]   ;;  %s5095_s21 = inlined_call_operand.vmem [shape: f32[1,128], index: 21, kind: input, shape index: {}]   ;;  %s5096_s22 = inlined_call_operand.hbm [shape: f32[2,128], index: 22, kind: output, shape index: {}]  }
   0x1   :  { %5103 = sst [smem:[#allocation7_spill]] %s5074_s0 }
   0x2   :  { %5104 = sst [smem:[#allocation8_spill]] %s5075_s1 }
   0x3   :  { %5105 = sst [smem:[#allocation9_spill]] %s5076_s2 }
   0x4   :  { %5106 = sst [smem:[#allocation10_spill]] %s5077_s3 }
   0x5   :  { %5107 = sst [smem:[#allocation11_spill]] %s5078_s4 }
   0x6   :  { %5108 = sst [smem:[#allocation12_spill]] %s5079_s5 }
   0x7   :  { %5109 = sst [smem:[#allocation13_spill]] %s5080_s6 }
   0x8   :  { %5110 = sst [smem:[#allocation14_spill]] %s5082_s8 }
   0x9   :  { %5111 = sst [smem:[#allocation15_spill]] %s5084_s10 }
   0xa   :  { %5112 = sst [smem:[#allocation16_spill]] %s5092_s18 }
   0xb   :  { %5113 = sst [smem:[#allocation17_spill]] %s5093_s19 }
   0xc   :  { %5114 = sst [smem:[#allocation18_spill]] %s5095_s21 }
   0xd   :  { %5115 = sst [smem:[#allocation19_spill]] %s5096_s22 }
   0xe   :  { %27 = vsyncpa [#allocation4], 0  ;;  %s4097_s3 = smov 0  }
   0xf LB: > { %5116 = sst [smem:[#allocation6_spill]] %s3972_s3  ;;  %s4103_s28 = sadd.s32 4294967295, %s3972_s3   ;;  %s3972_s3 = sphi %s4097_s3, %s33_s3  }
  0x10   : > { %p3137_p0 = scmp.ge.s32.totalorder %s3972_s3, 1  ;;  %p704_p1 = scmp.lt.s32.totalorder %s3972_s3, 3 }
  0x12   : > { %p705_p2 = pnand %p3137_p0, %p704_p1 }
  0x13   : > { %p802_p3 = scmp.lt.s32.totalorder (!%p705_p2), %s4103_s28, 1  ;;  %s5118_s10 = sld [smem:[#allocation15_spill]] (!%p705_p2) }
  0x14   : > { %708 = sbr.rel (%p705_p2) target bundleno = 2792 (0xae8), region = 108  ;;  %s5119_s8 = sld [smem:[#allocation14_spill]] (!%p705_p2) }
  0x15   : > { %p3146_p4 = scmp.ne.s32.totalorder (!%p705_p2), %s4103_s28, 0 }
  0x1b   : > { %s4109_s29 = scalar_select %p802_p3, %s4103_s28, 1 }
  0x1c   : > { %851 = sbr.rel (%p3146_p4) target bundleno = 325 (0x145), region = 112  ;;  %s5120_s4 = sld [smem:[#allocation8_spill]] (!%p3146_p4)  ;;  %vm1217_vm4 = vcmask (!%p3146_p4), 523264  }
  0x1d   : > { %s3828_s6 = smul.u32 192, %s4109_s29  ;;  %s3213_s25 = sshll.u32 %s4109_s29, 6 }
  0x1e   : > { %s3829_s26 = smul.u32 3, %s4109_s29  ;;  %s4125_s30 = scalar_lea.vmem %s5118_s10, %s3213_s25 }
  0x1f   : > { %s4130_s22 = scalar_lea.vmem %s5119_s8, %s3828_s6  ;;  %s3214_s3 = sshll.u32 %s4109_s29, 7 }
  0x20   : > { %s4139_s24 = scalar_lea.vmem %s5083_s9, %s3829_s26  ;;  %s4153_s8 = scalar_lea.vmem %s5088_s14, %s3214_s3 }
  0x21   : > { %s3143_s21 = sshll.u32 %s4109_s29, 1  ;;  %s3215_s1 = sshll.u32 %s4109_s29, 8 }
  0x22   : > { %s4159_s26 = scalar_lea.vmem %s5089_s15, %s3143_s21  ;;  %s4165_s19 = scalar_lea.vmem %s5090_s16, %s3215_s1  ;;  %v880_v0 = vld [vmem:[%s5120_s4 + $0x80] sm:$0xff] (!%p3146_p4)  ;;  %v881_v1 = vld [vmem:[%s5120_s4 + $0x88] sm:$0xff] (!%p3146_p4)  ;;  %v882_v11 = vld [vmem:[%s5120_s4 + $0x90] sm:$0xff] (!%p3146_p4) }
  0x23   : > { %v912_v2 = vld [vmem:[%s5120_s4 + $0x180] sm:$0xff]  ;;  %v3576_v3 = vpack.c.bf16 %v881_v1, %v880_v0  ;;  %v913_v4 = vld [vmem:[%s5120_s4 + $0x188] sm:$0xff]  ;;  %v883_v13 = vld [vmem:[%s5120_s4 + $0x98] sm:$0xff]  ;;  %s5121_s25 = sld [smem:[#allocation7_spill]]  ;;  %s5122_s0 = sld [smem:[#allocation11_spill]] }
  0x24   : > { %v864_v5 = vld [vmem:[%s5120_s4] sm:$0xff]  ;;  %v865_v6 = vld [vmem:[%s5120_s4 + $0x8] sm:$0xff]  ;;  %v3608_v7 = vpack.c.bf16 %v913_v4, %v912_v2  ;;  %v914_v14 = vld [vmem:[%s5120_s4 + $0x190] sm:$0xff]  ;;  %v3580_v16 = vpack.c.bf16 %v883_v13, %v882_v11  ;;  %s5123_s10 = sld [smem:[#allocation9_spill]]  ;;  %s5124_s23 = sld [smem:[#allocation10_spill]] }
  0x25   : > { %v3578_v8 = vpack.c.bf16 %v865_v6, %v864_v5  ;;  %v896_v9 = vld [vmem:[%s5120_s4 + $0x100] sm:$0xff]  ;;  %v897_v10 = vld [vmem:[%s5120_s4 + $0x108] sm:$0xff]  ;;  %3577 = vmatprep.subr.bf16.mxu0 %v3576_v3  ;;  %v915_v15 = vld [vmem:[%s5120_s4 + $0x198] sm:$0xff] }
  0x26   : > { %v3610_v12 = vpack.c.bf16 %v897_v10, %v896_v9  ;;  %3609 = vmatprep.subr.bf16.mxu1 %v3608_v7  ;;  %v3612_v17 = vpack.c.bf16 %v915_v15, %v914_v14  ;;  %v866_v18 = vld [vmem:[%s5120_s4 + $0x10] sm:$0xff]  ;;  %v867_v19 = vld [vmem:[%s5120_s4 + $0x18] sm:$0xff]  ;;  %v884_v23 = vld [vmem:[%s5120_s4 + $0xa0] sm:$0xff] }
  0x27   : > { %3579 = vmatpush3.bf16.msra.mxu0 %v3578_v8  ;;  %v898_v20 = vld [vmem:[%s5120_s4 + $0x110] sm:$0xff]  ;;  %v3582_v21 = vpack.c.bf16 %v867_v19, %v866_v18  ;;  %v899_v22 = vld [vmem:[%s5120_s4 + $0x118] sm:$0xff]  ;;  %v885_v24 = vld [vmem:[%s5120_s4 + $0xa8] sm:$0xff] }
  0x28   : > { %3611 = vmatpush3.bf16.msra.mxu1 %v3610_v12  ;;  %3581 = vmatprep.subr.bf16.mxu0 %v3580_v16  ;;  %v3614_v25 = vpack.c.bf16 %v899_v22, %v898_v20  ;;  %v3584_v26 = vpack.c.bf16 %v885_v24, %v884_v23  ;;  %v916_v27 = vld [vmem:[%s5120_s4 + $0x1a0] sm:$0xff]  ;;  %v917_v28 = vld [vmem:[%s5120_s4 + $0x1a8] sm:$0xff]  ;;  %v886_v35 = vld [vmem:[%s5120_s4 + $0xb0] sm:$0xff] }
  0x29   : > { %3613 = vmatprep.subr.bf16.mxu1 %v3612_v17  ;;  %v868_v29 = vld [vmem:[%s5120_s4 + $0x20] sm:$0xff]  ;;  %v3616_v30 = vpack.c.bf16 %v917_v28, %v916_v27  ;;  %v869_v31 = vld [vmem:[%s5120_s4 + $0x28] sm:$0xff]  ;;  %v887_v36 = vld [vmem:[%s5120_s4 + $0xb8] sm:$0xff] }
  0x2a   : > { %v900_v32 = vld [vmem:[%s5120_s4 + $0x120] sm:$0xff]  ;;  %v901_v33 = vld [vmem:[%s5120_s4 + $0x128] sm:$0xff]  ;;  %v3586_v34 = vpack.c.bf16 %v869_v31, %v868_v29  ;;  %v918_v37 = vld [vmem:[%s5120_s4 + $0x1b0] sm:$0xff]  ;;  %v3588_v39 = vpack.c.bf16 %v887_v36, %v886_v35 }
  0x2b   : > { %3583 = vmatpush3.bf16.msra.mxu0 %v3582_v21  ;;  %v3618_v38 = vpack.c.bf16 %v901_v33, %v900_v32  ;;  %v919_v40 = vld [vmem:[%s5120_s4 + $0x1b8] sm:$0xff]  ;;  %v870_v41 = vld [vmem:[%s5120_s4 + $0x30] sm:$0xff]  ;;  %v888_v46 = vld [vmem:[%s5120_s4 + $0xc0] sm:$0xff] }
  0x2c   : > { %3615 = vmatpush3.bf16.msra.mxu1 %v3614_v25  ;;  %3585 = vmatprep.subr.bf16.mxu0 %v3584_v26  ;;  %v871_v42 = vld [vmem:[%s5120_s4 + $0x38] sm:$0xff]  ;;  %v3620_v43 = vpack.c.bf16 %v919_v40, %v918_v37  ;;  %v902_v44 = vld [vmem:[%s5120_s4 + $0x130] sm:$0xff]  ;;  %v889_v47 = vld [vmem:[%s5120_s4 + $0xc8] sm:$0xff] }
  0x2d   : > { %3617 = vmatprep.subr.bf16.mxu1 %v3616_v30  ;;  %v903_v45 = vld [vmem:[%s5120_s4 + $0x138] sm:$0xff]  ;;  %v920_v48 = vld [vmem:[%s5120_s4 + $0x1c0] sm:$0xff]  ;;  %v921_v49 = vld [vmem:[%s5120_s4 + $0x1c8] sm:$0xff]  ;;  %v3590_v50 = vpack.c.bf16 %v871_v42, %v870_v41  ;;  %v3592_v52 = vpack.c.bf16 %v889_v47, %v888_v46 }
  0x2e   : > { %v3622_v51 = vpack.c.bf16 %v903_v45, %v902_v44  ;;  %v872_v53 = vld [vmem:[%s5120_s4 + $0x40] sm:$0xff]  ;;  %v873_v54 = vld [vmem:[%s5120_s4 + $0x48] sm:$0xff]  ;;  %v3624_v56 = vpack.c.bf16 %v921_v49, %v920_v48  ;;  %v890_v58 = vld [vmem:[%s5120_s4 + $0xd0] sm:$0xff] }
  0x2f   : > { %3587 = vmatpush3.bf16.msra.mxu0 %v3586_v34  ;;  %v904_v55 = vld [vmem:[%s5120_s4 + $0x140] sm:$0xff]  ;;  %v905_v57 = vld [vmem:[%s5120_s4 + $0x148] sm:$0xff]  ;;  %v891_v59 = vld [vmem:[%s5120_s4 + $0xd8] sm:$0xff]  ;;  %v3594_v62 = vpack.c.bf16 %v873_v54, %v872_v53 }
  0x30   : > { %3619 = vmatpush3.bf16.msra.mxu1 %v3618_v38  ;;  %3589 = vmatprep.subr.bf16.mxu0 %v3588_v39  ;;  %v922_v60 = vld [vmem:[%s5120_s4 + $0x1d0] sm:$0xff]  ;;  %v923_v61 = vld [vmem:[%s5120_s4 + $0x1d8] sm:$0xff]  ;;  %v3626_v63 = vpack.c.bf16 %v905_v57, %v904_v55  ;;  %v3596_v0 = vpack.c.bf16 %v891_v59, %v890_v58  ;;  %v892_v6 = vld [vmem:[%s5120_s4 + $0xe0] sm:$0xff] }
  0x31   : > { %3621 = vmatprep.subr.bf16.mxu1 %v3620_v43  ;;  %v874_v1 = vld [vmem:[%s5120_s4 + $0x50] sm:$0xff]  ;;  %v875_v2 = vld [vmem:[%s5120_s4 + $0x58] sm:$0xff]  ;;  %v3628_v4 = vpack.c.bf16 %v923_v61, %v922_v60  ;;  %v893_v7 = vld [vmem:[%s5120_s4 + $0xe8] sm:$0xff] }
  0x32   : > { %v906_v3 = vld [vmem:[%s5120_s4 + $0x150] sm:$0xff]  ;;  %v907_v5 = vld [vmem:[%s5120_s4 + $0x158] sm:$0xff]  ;;  %v924_v8 = vld [vmem:[%s5120_s4 + $0x1e0] sm:$0xff]  ;;  %v3598_v10 = vpack.c.bf16 %v875_v2, %v874_v1  ;;  %v3600_v14 = vpack.c.bf16 %v893_v7, %v892_v6 }
  0x33   : > { %3591 = vmatpush3.bf16.msra.mxu0 %v3590_v50  ;;  %v925_v9 = vld [vmem:[%s5120_s4 + $0x1e8] sm:$0xff]  ;;  %v876_v11 = vld [vmem:[%s5120_s4 + $0x60] sm:$0xff]  ;;  %v3630_v13 = vpack.c.bf16 %v907_v5, %v906_v3  ;;  %v855_v17 = vld [vmem:[%s5121_s25 + $0x18] sm:$0xff] }
  0x34   : > { %3623 = vmatpush3.bf16.msra.mxu1 %v3622_v51  ;;  %3593 = vmatprep.subr.bf16.mxu0 %v3592_v52  ;;  %v877_v12 = vld [vmem:[%s5120_s4 + $0x68] sm:$0xff]  ;;  %v908_v15 = vld [vmem:[%s5120_s4 + $0x160] sm:$0xff]  ;;  %v3632_v18 = vpack.c.bf16 %v925_v9, %v924_v8  ;;  %v894_v20 = vld [vmem:[%s5120_s4 + $0xf0] sm:$0xff] }
  0x35   : > { %3625 = vmatprep.subr.bf16.mxu1 %v3624_v56  ;;  %v853_v16 = vld [vmem:[%s5121_s25 + $0x8] sm:$0xff]  ;;  %v895_v21 = vld [vmem:[%s5120_s4 + $0xf8] sm:$0xff]  ;;  %v926_v22 = vld [vmem:[%s5120_s4 + $0x1f0] sm:$0xff]  ;;  %1111 = vmatprep.mubr.f32.mxu1 %v855_v17  ;;  %v3602_v24 = vpack.c.bf16 %v877_v12, %v876_v11 }
  0x36   : > { %v909_v19 = vld [vmem:[%s5120_s4 + $0x168] sm:$0xff]  ;;  %1036 = vmatprep.mubr.f32.mxu0 %v853_v16  ;;  %v927_v23 = vld [vmem:[%s5120_s4 + $0x1f8] sm:$0xff]  ;;  %v3604_v26 = vpack.c.bf16 %v895_v21, %v894_v20  ;;  %v878_v27 = vld [vmem:[%s5120_s4 + $0x70] sm:$0xff] }
  0x37   : > { %3595 = vmatpush3.bf16.msra.mxu0 %v3594_v62  ;;  %v3634_v25 = vpack.c.bf16 %v909_v19, %v908_v15  ;;  %v879_v28 = vld [vmem:[%s5120_s4 + $0x78] sm:$0xff]  ;;  %v910_v29 = vld [vmem:[%s5120_s4 + $0x170] sm:$0xff]  ;;  %v3636_v30 = vpack.c.bf16 %v927_v23, %v926_v22  ;;  %v944_v32 = vld [vmem:[%s5120_s4 + $0x280] sm:$0xff] }
  0x38   : > { %3627 = vmatpush3.bf16.msra.mxu1 %v3626_v63  ;;  %3597 = vmatprep.subr.bf16.mxu0 %v3596_v0  ;;  %v911_v31 = vld [vmem:[%s5120_s4 + $0x178] sm:$0xff]  ;;  %v945_v33 = vld [vmem:[%s5120_s4 + $0x288] sm:$0xff]  ;;  %v3606_v34 = vpack.c.bf16 %v879_v28, %v878_v27  ;;  %v928_v37 = vld [vmem:[%s5120_s4 + $0x200] sm:$0xff] }
  0x39   : > { %3629 = vmatprep.subr.bf16.mxu1 %v3628_v4  ;;  %v3638_v35 = vpack.c.bf16 %v911_v31, %v910_v29  ;;  %v3640_v36 = vpack.c.bf16 %v945_v33, %v944_v32  ;;  %v929_v38 = vld [vmem:[%s5120_s4 + $0x208] sm:$0xff]  ;;  %v946_v39 = vld [vmem:[%s5120_s4 + $0x290] sm:$0xff]  ;;  %v947_v40 = vld [vmem:[%s5120_s4 + $0x298] sm:$0xff] }
  0x3a   : > { %v852_v41 = vld [vmem:[%s5121_s25] sm:$0xff]  ;;  %v3642_v42 = vpack.c.bf16 %v929_v38, %v928_v37  ;;  %v854_v43 = vld [vmem:[%s5121_s25 + $0x10] sm:$0xff]  ;;  %v3644_v44 = vpack.c.bf16 %v947_v40, %v946_v39  ;;  %v931_v46 = vld [vmem:[%s5120_s4 + $0x218] sm:$0xff] }
  0x3b   : > { %3599 = vmatpush3.bf16.msra.mxu0 %v3598_v10  ;;  %v930_v45 = vld [vmem:[%s5120_s4 + $0x210] sm:$0xff]  ;;  %v948_v47 = vld [vmem:[%s5120_s4 + $0x2a0] sm:$0xff]  ;;  %v949_v48 = vld [vmem:[%s5120_s4 + $0x2a8] sm:$0xff] }
  0x3c   : > { %3631 = vmatpush3.bf16.msra.mxu1 %v3630_v13  ;;  %3601 = vmatprep.subr.bf16.mxu0 %v3600_v14  ;;  %v859_v49 = vld [vmem:[%s5121_s25 + $0x38] sm:$0xff]  ;;  %v3646_v50 = vpack.c.bf16 %v931_v46, %v930_v45  ;;  %v858_v51 = vld [vmem:[%s5121_s25 + $0x30] sm:$0xff]  ;;  %v861_v52 = vld [vmem:[%s5121_s25 + $0x48] sm:$0xff]  ;;  %v3648_v53 = vpack.c.bf16 %v949_v48, %v948_v47  ;;  %v960_v46 = vlaneseq  ;;  %v3974_v48 = vmov 0.0  }
  0x3d   : > { %3633 = vmatprep.subr.bf16.mxu1 %v3632_v18  ;;  %v932_v54 = vld [vmem:[%s5120_s4 + $0x220] sm:$0xff]  ;;  %v933_v55 = vld [vmem:[%s5120_s4 + $0x228] sm:$0xff]  ;;  %v950_v57 = vld [vmem:[%s5120_s4 + $0x2b0] sm:$0xff] }
  0x3e   : > { %v860_v56 = vld [vmem:[%s5121_s25 + $0x40] sm:$0xff]  ;;  %v951_v58 = vld [vmem:[%s5120_s4 + $0x2b8] sm:$0xff]  ;;  %v857_v59 = vld [vmem:[%s5121_s25 + $0x28] sm:$0xff]  ;;  %v3650_v60 = vpack.c.bf16 %v933_v55, %v932_v54  ;;  %v961_v47 = vshrl.u32 %v960_v46, 7 }
  0x3f   : > { %3603 = vmatpush3.bf16.msra.mxu0 %v3602_v24  ;;  %v863_v61 = vld [vmem:[%s5121_s25 + $0x58] sm:$0xff]  ;;  %v3652_v62 = vpack.c.bf16 %v951_v58, %v950_v57  ;;  %v934_v63 = vld [vmem:[%s5120_s4 + $0x230] sm:$0xff]  ;;  %v952_v1 = vld [vmem:[%s5120_s4 + $0x2c0] sm:$0xff] }
  0x40   : > { %3635 = vmatpush3.bf16.msra.mxu1 %v3634_v25  ;;  %3605 = vmatprep.subr.bf16.mxu0 %v3604_v26  ;;  %v935_v0 = vld [vmem:[%s5120_s4 + $0x238] sm:$0xff]  ;;  %v953_v2 = vld [vmem:[%s5120_s4 + $0x2c8] sm:$0xff]  ;;  %v936_v5 = vld [vmem:[%s5120_s4 + $0x240] sm:$0xff]  ;;  %vm965_vm0 = vcmp.ge.s32.totalorder %v961_v47, 1  ;;  %vm966_vm1 = vcmp.lt.s32.totalorder %v961_v47, 5  ;;  %vm962_vm3 = vcmp.eq.s32.totalorder %v961_v47, 0 }
  0x41   : > { %3637 = vmatprep.subr.bf16.mxu1 %v3636_v30  ;;  %v3654_v3 = vpack.c.bf16 %v935_v0, %v934_v63  ;;  %v3656_v4 = vpack.c.bf16 %v953_v2, %v952_v1  ;;  %v937_v6 = vld [vmem:[%s5120_s4 + $0x248] sm:$0xff]  ;;  %v954_v7 = vld [vmem:[%s5120_s4 + $0x2d0] sm:$0xff]  ;;  %v955_v8 = vld [vmem:[%s5120_s4 + $0x2d8] sm:$0xff] }
  0x42   : > { %v3658_v9 = vpack.c.bf16 %v937_v6, %v936_v5  ;;  %v3660_v10 = vpack.c.bf16 %v955_v8, %v954_v7  ;;  %v938_v11 = vld [vmem:[%s5120_s4 + $0x250] sm:$0xff]  ;;  %v939_v12 = vld [vmem:[%s5120_s4 + $0x258] sm:$0xff]  ;;  %v956_v13 = vld [vmem:[%s5120_s4 + $0x2e0] sm:$0xff] }
  0x43   : > { %3607 = vmatpush3.bf16.msra.mxu0 %v3606_v34  ;;  %v957_v14 = vld [vmem:[%s5120_s4 + $0x2e8] sm:$0xff]  ;;  %v3662_v15 = vpack.c.bf16 %v939_v12, %v938_v11  ;;  %v940_v17 = vld [vmem:[%s5120_s4 + $0x260] sm:$0xff]  ;;  %v958_v19 = vld [vmem:[%s5120_s4 + $0x2f0] sm:$0xff] }
  0x44   : > { %3639 = vmatpush3.bf16.msra.mxu1 %v3638_v35  ;;  %3641 = vmatprep.subr.bf16.mxu0 %v3640_v36  ;;  %v3664_v16 = vpack.c.bf16 %v957_v14, %v956_v13  ;;  %v941_v18 = vld [vmem:[%s5120_s4 + $0x268] sm:$0xff]  ;;  %v959_v20 = vld [vmem:[%s5120_s4 + $0x2f8] sm:$0xff]  ;;  %v942_v23 = vld [vmem:[%s5120_s4 + $0x270] sm:$0xff] }
  0x45   : > { %3812 = vmatprep.subr.bf16.mxu1 %v3640_v36  ;;  %v3666_v21 = vpack.c.bf16 %v941_v18, %v940_v17  ;;  %v3668_v22 = vpack.c.bf16 %v959_v20, %v958_v19  ;;  %v943_v24 = vld [vmem:[%s5120_s4 + $0x278] sm:$0xff]  ;;  %v856_v26 = vld [vmem:[%s5121_s25 + $0x20] sm:$0xff]  ;;  %v862_v27 = vld [vmem:[%s5121_s25 + $0x50] sm:$0xff] }
  0x46   : > { %1037 = vmatmul.mubr.f32.vlgmr.msra.gmra.mrb[0].mxu0 %v852_v41  ;;  %v3670_v25 = vpack.c.bf16 %v943_v24, %v942_v23  ;;  %v970_v30 = vld [vmem:[%s5122_s0] sm:$0xff]  ;;  %v971_v37 = vld [vmem:[%s5122_s0 + $0x8] sm:$0xff]  ;;  %vm967_vm2 = vmand %vm965_vm0, %vm966_vm1 }
  0x47   : > { %1112 = vmatmul.mubr.f32.vlgmr.msra.gmra.mrb[0].mxu1 %v854_v43  ;;  %3643 = vmatpush3.bf16.msra.mxu0 %v3642_v42  ;;  %v3150_v55 = vld [vmem:[%s5124_s23] ss:$0 sm:$0xff] }
  0x48   : > { %3820 = vmatpush3.bf16.msra.mxu1 %v3642_v42  ;;  %3645 = vmatprep.subr.bf16.mxu0 %v3644_v44 }
  0x49   : > { %3813 = vmatprep.subr.bf16.mxu1 %v3644_v44  ;;  %1041 = vmatprep.mubr.f32.mxu0 %v859_v49  ;;  %v3148_v49 = vsel %vm967_vm2, 1.0, %v3974_v48 }
  0x4a   : > { %1042 = vmatmul.mubr.f32.gmra.mrb[2].mxu0 %v858_v51  ;;  %1116 = vmatprep.mubr.f32.mxu1 %v861_v52 }
  0x4b   : > { %3647 = vmatpush3.bf16.msra.mxu0 %v3646_v50  ;;  %1117 = vmatmul.mubr.f32.gmra.mrb[2].mxu1 %v860_v56 }
  0x4c   : > { %3821 = vmatpush3.bf16.msra.mxu1 %v3646_v50  ;;  %3649 = vmatprep.subr.bf16.mxu0 %v3648_v53  ;;  %v3149_v50 = vld [vmem:[%s5123_s10] ss:$0 sm:$0xff] }
  0x4d   : > { %3814 = vmatprep.subr.bf16.mxu1 %v3648_v53  ;;  %1186 = vmatprep.mubr.f32.mxu0 %v857_v59  ;;  %v3147_v53 = vsel %vm962_vm3, 1.0, %v3974_v48  ;;  %v1204_v57 = vmul.f32 %v3149_v50, %v3148_v49 }
  0x4e   : > { %1191 = vmatprep.mubr.f32.mxu1 %v863_v61  ;;  %v1214_v61 = vmul.f32 %v3150_v55, %v3147_v53 }
  0x4f   : > { %3651 = vmatpush3.bf16.msra.mxu0 %v3650_v60 }
  0x50   : > { %3822 = vmatpush3.bf16.msra.mxu1 %v3650_v60  ;;  %3653 = vmatprep.subr.bf16.mxu0 %v3652_v62 }
  0x51   : > { %3815 = vmatprep.subr.bf16.mxu1 %v3652_v62 }
  0x53   : > { %3655 = vmatpush3.bf16.msra.mxu0 %v3654_v3 }
  0x54   : > { %3823 = vmatpush3.bf16.msra.mxu1 %v3654_v3  ;;  %3657 = vmatprep.subr.bf16.mxu0 %v3656_v4 }
  0x55   : > { %3816 = vmatprep.subr.bf16.mxu1 %v3656_v4 }
  0x57   : > { %3659 = vmatpush3.bf16.msra.mxu0 %v3658_v9 }
  0x58   : > { %3824 = vmatpush3.bf16.msra.mxu1 %v3658_v9  ;;  %3661 = vmatprep.subr.bf16.mxu0 %v3660_v10 }
  0x59   : > { %3817 = vmatprep.subr.bf16.mxu1 %v3660_v10 }
  0x5b   : > { %3663 = vmatpush3.bf16.msra.mxu0 %v3662_v15 }
  0x5c   : > { %3825 = vmatpush3.bf16.msra.mxu1 %v3662_v15  ;;  %3665 = vmatprep.subr.bf16.mxu0 %v3664_v16 }
  0x5d   : > { %3818 = vmatprep.subr.bf16.mxu1 %v3664_v16 }
  0x5f   : > { %3667 = vmatpush3.bf16.msra.mxu0 %v3666_v21 }
  0x60   : > { %3826 = vmatpush3.bf16.msra.mxu1 %v3666_v21  ;;  %3669 = vmatprep.subr.bf16.mxu0 %v3668_v22 }
  0x61   : > { %3819 = vmatprep.subr.bf16.mxu1 %v3668_v22 }
  0x63   : > { %3671 = vmatpush3.bf16.msra.mxu0 %v3670_v25 }
  0x64   : > { %3827 = vmatpush3.bf16.msra.mxu1 %v3670_v25 }
  0x66   : > { %1187 = vmatmul.mubr.f32.vlgmr.msra.gmra.mrb[4].mxu0 %v856_v26 }
  0x67   : > { %1192 = vmatmul.mubr.f32.vlgmr.msra.gmra.mrb[4].mxu1 %v862_v27 }
 0x119   : > { %v3248_v28 = vpop.f32.mrb[0].mxu0 }
 0x11a   : > { %v3286_v29 = vpop.f32.mrb[0].mxu1  ;;  %v3249_v31 = vpop.f32.mrb[1].mxu0 }
 0x11b   : > { %v3250_v32 = vadd.f32 %v3249_v31, %v3248_v28  ;;  %v3287_v33 = vpop.f32.mrb[1].mxu1 }
 0x11c   : > { %v3288_v34 = vadd.f32 %v3287_v33, %v3286_v29 }
 0x11d   : > { %v1039_v35 = vadd.f32 %v3250_v32, %v970_v30  ;;  %v3251_v36 = vpop.f32.mrb[2].mxu0 }
 0x11e   : > { %v3252_v38 = vpop.f32.mrb[3].mxu0  ;;  %v3289_v39 = vpop.f32.mrb[2].mxu1 }
 0x11f   : > { %v1114_v40 = vadd.f32 %v3288_v34, %v1039_v35  ;;  %v3253_v41 = vadd.f32 %v3252_v38, %v3251_v36  ;;  %v3290_v42 = vpop.f32.mrb[3].mxu1 }
 0x120   : > { %v3291_v43 = vadd.f32 %v3290_v42, %v3289_v39 }
 0x121   : > { %v1044_v44 = vadd.f32 %v3253_v41, %v971_v37 }
 0x123   : > { %v1119_v45 = vadd.f32 %v3291_v43, %v1044_v44 }
 0x139   : > { %v3324_v51 = vpop.f32.mrb[4].mxu0 }
 0x13a   : > { %v3327_v52 = vpop.f32.mrb[4].mxu1  ;;  %v3325_v54 = vpop.f32.mrb[5].mxu0 }
 0x13b   : > { %v3326_v56 = vadd.f32 %v3325_v54, %v3324_v51  ;;  %v3328_v58 = vpop.f32.mrb[5].mxu1 }
 0x13c   : > { %v3329_v59 = vadd.f32 %v3328_v58, %v3327_v52 }
 0x13d   : > { %v1189_v60 = vadd.f32 %v3326_v56, %v1114_v40 }
 0x13e   : > { %v1194_v62 = vadd.f32 %v3329_v59, %v1119_v45 }
 0x13f   : > { %v1205_v63 = vadd.f32 %v1204_v57, %v1189_v60 }
 0x140   : > { %v1206_v0 = vadd.f32 %v1204_v57, %v1194_v62 }
 0x141   : > { %v1215_v1 = vadd.f32 %v1214_v61, %v1205_v63 }
 0x142   : > { %v1216_v2 = vadd.f32 %v1214_v61, %v1206_v0 }
 0x143   : > { %1218 = vst.msk [vmem:[#allocation2] sm:$0xff] %vm1217_vm4, %v1215_v1 }
 0x144   : > { %1219 = vst.msk [vmem:[#allocation2 + $0x8] sm:$0xff] %vm1217_vm4, %v1216_v2 }
 0x145 PF: > { %vm1224_vm5 = vcmask 523264   ;;  %v1268_v17 = vld [vmem:[%s4130_s22] sm:$0xff]  ;;  %v1269_v18 = vld [vmem:[%s4130_s22 + $0x8] sm:$0xff]  ;;  %v1270_v23 = vld [vmem:[%s4130_s22 + $0x10] sm:$0xff]  ;;  %s5125_s1 = sld [smem:[#allocation13_spill]]  ;;  %s5127_s10 = scalar_lea.vmem %s5081_s7, %s4109_s29  ;;  %vm2430_vm7 = vcmask 1041409  }
 0x146   : > { %v3672_v19 = vpack.c.bf16 %v1269_v18, %v1268_v17  ;;  %v3156_v20 = vld [vmem:[%s4130_s22 + $0x40] sm:$0xff]  ;;  %v3157_v21 = vld [vmem:[%s4130_s22 + $0x48] sm:$0xff]  ;;  %v1271_v24 = vld [vmem:[%s4130_s22 + $0x18] sm:$0xff]  ;;  %s5128_s23 = sld [smem:[#allocation12_spill]]  ;;  %v3975_v17 = vmov 1966171168   ;;  %s5130_s27 = scalar_lea.vmem %s5086_s12, %s4109_s29 }
 0x147   : > { %v3688_v22 = vpack.c.bf16 %v3157_v21, %v3156_v20  ;;  %v3158_v25 = vld [vmem:[%s4130_s22 + $0x50] sm:$0xff]  ;;  %v3676_v26 = vpack.c.bf16 %v1271_v24, %v1270_v23  ;;  %v3159_v27 = vld [vmem:[%s4130_s22 + $0x58] sm:$0xff]  ;;  %v1272_v28 = vld [vmem:[%s4130_s22 + $0x20] sm:$0xff]  ;;  %v1554_v18 = vunpack.c.l.s4 %v3975_v17  ;;  %vm2432_vm8 = vcmask 1042434   ;;  %s5131_s6 = scalar_lea.vmem %s5087_s13, %s4109_s29  ;;  %s5132_s2 = scalar_lea.vmem %s5091_s17, %s4109_s29 }
 0x148   : > { %3673 = vmatprep.subr.bf16.mxu0 %v3672_v19  ;;  %v1273_v29 = vld [vmem:[%s4130_s22 + $0x28] sm:$0xff]  ;;  %v3692_v30 = vpack.c.bf16 %v3159_v27, %v3158_v25  ;;  %v3160_v32 = vld [vmem:[%s4130_s22 + $0x60] sm:$0xff]  ;;  %v1274_v35 = vld [vmem:[%s4130_s22 + $0x30] sm:$0xff]  ;;  %vm2434_vm9 = vcmask 1043459   ;;  %vm2436_vm10 = vcmask 1044484   ;;  %vm2438_vm11 = vcmask 1045509  }
 0x149   : > { %3675 = vmatpush3.bf16.msra.mxu0 %v3672_v19  ;;  %3689 = vmatprep.subr.bf16.mxu1 %v3688_v22  ;;  %v3680_v31 = vpack.c.bf16 %v1273_v29, %v1272_v28  ;;  %v3161_v33 = vld [vmem:[%s4130_s22 + $0x68] sm:$0xff]  ;;  %v1275_v36 = vld [vmem:[%s4130_s22 + $0x38] sm:$0xff]  ;;  %v3162_v38 = vld [vmem:[%s4130_s22 + $0x70] sm:$0xff]  ;;  %v1556_v19 = vlaneseq  ;;  %v1555_v20 = vunpack.c.0.s8 %v1554_v18  ;;  %vm2440_vm12 = vcmask 1046534   ;;  %p3204_p5 = scmp.ne.s32.totalorder %s4103_s28, 1 }
 0x14a   : > { %v1220_v3 = vld [vmem:[#allocation2] sm:$0xff]  ;;  %3691 = vmatpush3.bf16.msra.mxu1 %v3688_v22  ;;  %3677 = vmatprep.subr.bf16.mxu0 %v3676_v26  ;;  %v3696_v34 = vpack.c.bf16 %v3161_v33, %v3160_v32  ;;  %v3684_v37 = vpack.c.bf16 %v1275_v36, %v1274_v35  ;;  %v3163_v39 = vld [vmem:[%s4130_s22 + $0x78] sm:$0xff]  ;;  %v3169_v42 = vld [vmem:[%s4130_s22 + $0x88] sm:$0xff]  ;;  %vm2442_vm13 = vcmask 1047559   ;;  %vm2836_vm14 = vcmask (!%p3204_p5), 517120   ;;  %s5135_s18 = sld [smem:[#allocation18_spill]] (!%p3204_p5) }
 0x14b   : > { %v1221_v4 = vld [vmem:[#allocation2 + $0x8] sm:$0xff]  ;;  %v1225_v5 = vsel %vm1224_vm5, %v1220_v3, 0.0  ;;  %3693 = vmatprep.subr.bf16.mxu1 %v3692_v30  ;;  %v3700_v40 = vpack.c.bf16 %v3163_v39, %v3162_v38  ;;  %v3168_v41 = vld [vmem:[%s4130_s22 + $0x80] sm:$0xff]  ;;  %s5126_s5 = scalar_lea.vmem %s5125_s1, %s4109_s29  ;;  %v3170_v58 = vld [vmem:[%s4130_s22 + $0x90] sm:$0xff]  ;;  %v4586_v21 = vshrl.u32 %v1556_v19, 7  ;;  %vm3979_vm15 = vmmov (!%p3204_p5), 0  }
 0x14c   : > { %1226 = vadd.xlane.f32.xlu0 %v1225_v5  ;;  %v1228_v6 = vsel %vm1224_vm5, %v1221_v4, 0.0  ;;  %v3704_v43 = vpack.c.bf16 %v3169_v42, %v3168_v41  ;;  %v3151_v51 = vld [vmem:[%s5126_s5] ss:$0 sm:$0xff]  ;;  %v3171_v59 = vld [vmem:[%s4130_s22 + $0x98] sm:$0xff]  ;;  %v3173_v0 = vld [vmem:[%s4130_s22 + $0xa8] sm:$0xff]  ;;  %s5129_s5 = scalar_lea.vmem %s5085_s11, %s4109_s29 }
 0x14d   : > { %3679 = vmatpush3.bf16.msra.mxu0 %v3676_v26  ;;  %v3152_v53 = vld [vmem:[%s5127_s10] ss:$0 sm:$0xff]  ;;  %v3708_v62 = vpack.c.bf16 %v3171_v59, %v3170_v58  ;;  %v3174_v2 = vld [vmem:[%s4130_s22 + $0xb0] sm:$0xff]  ;;  %v1558_v26 = vsub.s32 %v1555_v20, %v4586_v21  ;;  %v4592_v35 = vsub.s32 0, %v4586_v21  ;;  %vm1949_vm6 = vcmp.lt.s32.totalorder %v4586_v21, 5 }
 0x14e   : > { %3695 = vmatpush3.bf16.msra.mxu1 %v3692_v30  ;;  %3681 = vmatprep.subr.bf16.mxu0 %v3680_v31  ;;  %v3172_v63 = vld [vmem:[%s4130_s22 + $0xa0] sm:$0xff] }
 0x14f   : > { %3697 = vmatprep.subr.bf16.mxu1 %v3696_v34  ;;  %v3712_v1 = vpack.c.bf16 %v3173_v0, %v3172_v63  ;;  %v1746_v5 = vld [vmem:[%s5128_s23] sm:$0xff] }
 0x150   : > { %1229 = vadd.xlane.f32.xlu0 %v1228_v6  ;;  %v1747_v6 = vld [vmem:[%s5128_s23 + $0x8] sm:$0xff]  ;;  %v3153_v22 = vld [vmem:[%s4139_s24] ss:$0 sm:$0xff] }
 0x151   : > { %3683 = vmatpush3.bf16.msra.mxu0 %v3680_v31  ;;  %v3165_v31 = vld [vmem:[%s4139_s24 + $0x1] ss:$0 sm:$0xff] }
 0x152   : > { %3699 = vmatpush3.bf16.msra.mxu1 %v3696_v34  ;;  %3685 = vmatprep.subr.bf16.mxu0 %v3684_v37 }
 0x153   : > { %3701 = vmatprep.subr.bf16.mxu1 %v3700_v40 }
 0x155   : > { %3687 = vmatpush3.bf16.msra.mxu0 %v3684_v37 }
 0x156   : > { %3703 = vmatpush3.bf16.msra.mxu1 %v3700_v40  ;;  %3705 = vmatprep.subr.bf16.mxu0 %v3704_v43 }
 0x1d9   : > { %v1227_v7 = vpop.xlane.xlu0 %1226 }
 0x1da   : > { %v1232_v8 = vmul.f32 0.015625, %v1227_v7  ;;  %v3720_v7 = vpack.c.bf16 %v1747_v6, %v1746_v5 }
 0x1dc   : > { %v4510_v9 = vsub.f32 %v1220_v3, %v1232_v8  ;;  %v3175_v3 = vld [vmem:[%s4130_s22 + $0xb8] sm:$0xff]  ;;  %3721 = vmatprep.subr.bf16.mxu1 %v3720_v7  ;;  %v1748_v8 = vld [vmem:[%s5128_s23 + $0x10] sm:$0xff]  ;;  %s5133_s22 = sld [smem:[#allocation16_spill]] (!%p3204_p5) }
 0x1dd   : > { %v1230_v10 = vpop.xlane.xlu0 %1229 }
 0x1de   : > { %v1233_v11 = vmul.f32 0.015625, %v1230_v10  ;;  %v1236_v12 = vmul.f32 %v4510_v9, %v4510_v9 }
 0x1e0   : > { %v4514_v13 = vsub.f32 %v1221_v4, %v1233_v11  ;;  %v1238_v14 = vsel %vm1224_vm5, %v1236_v12, 0.0  ;;  %v3716_v4 = vpack.c.bf16 %v3175_v3, %v3174_v2  ;;  %v1750_v11 = vld [vmem:[%s5128_s23 + $0x20] sm:$0xff]  ;;  %v1751_v12 = vld [vmem:[%s5128_s23 + $0x28] sm:$0xff] }
 0x1e1   : > { %1239 = vadd.xlane.f32.xlu1 %v1238_v14  ;;  %v1752_v14 = vld [vmem:[%s5128_s23 + $0x30] sm:$0xff] }
 0x1e2   : > { %v1237_v15 = vmul.f32 %v4514_v13, %v4514_v13 }
 0x1e4   : > { %v1241_v16 = vsel %vm1224_vm5, %v1237_v15, 0.0  ;;  %v1753_v15 = vld [vmem:[%s5128_s23 + $0x38] sm:$0xff] }
 0x1e5   : > { %1242 = vadd.xlane.f32.xlu1 %v1241_v16  ;;  %v3732_v16 = vpack.c.bf16 %v1753_v15, %v1752_v14 }
 0x26e   : > { %v1240_v44 = vpop.xlane.xlu1 %1239 }
 0x26f   : > { %v1244_v45 = vmul.f32 0.015625, %v1240_v44 }
 0x271   : > { %v1246_v46 = vadd.f32 1e-06, %v1244_v45 }
 0x272   : > { %v1243_v47 = vpop.xlane.xlu1 %1242 }
 0x273   : > { %3852 = vrsqrt.f32 %v1246_v46  ;;  %v1245_v48 = vmul.f32 0.015625, %v1243_v47 }
 0x275   : > { %v1247_v49 = vadd.f32 1e-06, %v1245_v48 }
 0x277   : > { %3854 = vrsqrt.f32 %v1247_v49 }
 0x27d   : > { %v3853_v50 = vpop.eup %3852 }
 0x27e   : > { %v1250_v52 = vmul.f32 %v3853_v50, %v4510_v9  ;;  %v1749_v9 = vld [vmem:[%s5128_s23 + $0x18] sm:$0xff] }
 0x27f   : > { %v3724_v10 = vpack.c.bf16 %v1749_v9, %v1748_v8 }
 0x280   : > { %v1258_v54 = vmul.f32 %v3151_v51, %v1250_v52 }
 0x281   : > { %v3855_v55 = vpop.eup %3854 }
 0x282   : > { %v1251_v56 = vmul.f32 %v3855_v55, %v4514_v13  ;;  %v1266_v57 = vadd.f32 %v3152_v53, %v1258_v54  ;;  %v3728_v13 = vpack.c.bf16 %v1751_v12, %v1750_v11 }
 0x284   : > { %v1259_v60 = vmul.f32 %v3151_v51, %v1251_v56  ;;  %3457 = vmatprep.mubr.msk.f32.mxu0 %vm1224_vm5, %v1266_v57  ;;  %3476 = vmatprep.mubr.msk.f32.mxu1 %vm1224_vm5, %v1266_v57 }
 0x286   : > { %v1267_v61 = vadd.f32 %v3152_v53, %v1259_v60 }
 0x288   : > { %3458 = vmatmul.mubr.msk.f32.vlgmr.msra.gmra.mrb[0].mxu0 %vm1224_vm5, %v1267_v61  ;;  %3477 = vmatmul.mubr.msk.f32.vlgmr.msra.gmra.mrb[0].mxu1 %vm1224_vm5, %v1267_v61 }
 0x289   : > { %3707 = vmatpush3.bf16.msra.mxu0 %v3704_v43  ;;  %3495 = vmatprep.mubr.msk.f32.mxu0 %vm1224_vm5, %v1266_v57 }
 0x28a   : > { %3709 = vmatprep.subr.bf16.mxu0 %v3708_v62  ;;  %3723 = vmatpush3.bf16.msra.mxu1 %v3720_v7 }
 0x28b   : > { %3725 = vmatprep.subr.bf16.mxu1 %v3724_v10 }
 0x28d   : > { %3711 = vmatpush3.bf16.msra.mxu0 %v3708_v62 }
 0x28e   : > { %3713 = vmatprep.subr.bf16.mxu0 %v3712_v1  ;;  %3727 = vmatpush3.bf16.msra.mxu1 %v3724_v10 }
 0x28f   : > { %3729 = vmatprep.subr.bf16.mxu1 %v3728_v13 }
 0x291   : > { %3715 = vmatpush3.bf16.msra.mxu0 %v3712_v1 }
 0x292   : > { %3717 = vmatprep.subr.bf16.mxu0 %v3716_v4  ;;  %3731 = vmatpush3.bf16.msra.mxu1 %v3728_v13 }
 0x293   : > { %3733 = vmatprep.subr.bf16.mxu1 %v3732_v16 }
 0x295   : > { %3719 = vmatpush3.bf16.msra.mxu0 %v3716_v4 }
 0x296   : > { %3735 = vmatpush3.bf16.msra.mxu1 %v3732_v16 }
 0x298   : > { %3496 = vmatmul.mubr.msk.f32.vlgmr.msra.gmra.mrb[2].mxu0 %vm1224_vm5, %v1267_v61 }
 0x35b   : > { %v3459_v23 = vpop.f32.mrb[0].mxu0  ;;  %v3478_v24 = vpop.f32.mrb[0].mxu1 }
 0x35c   : > { %v1361_v25 = vadd.f32 %v3459_v23, %v3153_v22  ;;  %v1355_v27 = vpop.f32.mrb[1].mxu0  ;;  %v1447_v28 = vpop.f32.mrb[1].mxu1  ;;  %v1453_v41 = vadd.f32 %v3478_v24, %v3165_v31 }
 0x35d   : > { %v1356_v29 = vadd.f32 %v3153_v22, %v1355_v27  ;;  %v1448_v45 = vadd.f32 %v3165_v31, %v1447_v28 }
 0x35e   : > { %v1549_v30 = vmul.f32 0.25, %v1361_v25 }
 0x35f   : > { %v1548_v32 = vmul.f32 0.25, %v1356_v29 }
 0x360   : > { %v1601_v33 = vcombine.high %v1549_v30, %v1549_v30  ;;  %v1608_v34 = vrot.slane %v1549_v30, %v1558_v26 }
 0x361   : > { %v1552_v36 = vcombine.high %v1548_v32, %v1548_v32  ;;  %v1559_v37 = vrot.slane %v1548_v32, %v1558_v26 }
 0x362   : > { %v1615_v38 = vrot.slane %v1601_v33, %v1558_v26  ;;  %v1616_v39 = vcombine.high %v1608_v34, %v1608_v34  ;;  %v1624_v40 = vrot.slane %v1608_v34, %v1558_v26  ;;  %v3976_v33 = vmov -1e+30  }
 0x363   : > { %v1566_v42 = vrot.slane %v1552_v36, %v1558_v26  ;;  %v1567_v43 = vcombine.high %v1559_v37, %v1559_v37  ;;  %v1575_v44 = vrot.slane %v1559_v37, %v1558_v26  ;;  %v4631_v34 = vsel %vm1949_vm6, 0.0, %v3976_v33  ;;  %v2399_v36 = vld [vmem:[%s4125_s30] sm:$0xff]  ;;  %v2400_v37 = vld [vmem:[%s4125_s30 + $0x8] sm:$0xff] }
 0x364   : > { %v1617_v46 = vcombine.high %v1615_v38, %v1615_v38  ;;  %v1631_v47 = vrot.slane %v1615_v38, %v1558_v26  ;;  %v1638_v48 = vrot.slane %v1616_v39, %v1558_v26  ;;  %v1646_v49 = vcombine.high %v1624_v40, %v1624_v40 }
 0x365   : > { %v1685_v50 = vrot.slane %v1624_v40, %v4592_v35  ;;  %v1568_v51 = vcombine.high %v1566_v42, %v1566_v42  ;;  %v1582_v52 = vrot.slane %v1566_v42, %v1558_v26  ;;  %v1589_v53 = vrot.slane %v1567_v43, %v1558_v26  ;;  %v2401_v42 = vld [vmem:[%s4125_s30 + $0x10] sm:$0xff]  ;;  %v2402_v43 = vld [vmem:[%s4125_s30 + $0x18] sm:$0xff] }
 0x366   : > { %v1645_v54 = vrot.slane %v1617_v46, %v1558_v26  ;;  %v1647_v55 = vcombine.high %v1631_v47, %v1631_v47  ;;  %v1648_v56 = vcombine.high %v1638_v48, %v1638_v48  ;;  %v1689_v57 = vrot.slane %v1638_v48, %v4592_v35 }
 0x367   : > { %v1693_v58 = vrot.slane %v1646_v49, %v4592_v35  ;;  %v1701_v59 = vrot.slane %v1631_v47, %v4592_v35  ;;  %v1596_v60 = vrot.slane %v1568_v51, %v1558_v26  ;;  %v1597_v61 = vcombine.high %v1575_v44, %v1575_v44  ;;  %v2404_v47 = vld [vmem:[%s4125_s30 + $0x28] sm:$0xff] }
 0x368   : > { %v1649_v62 = vcombine.high %v1645_v54, %v1645_v54  ;;  %v1598_v63 = vcombine.high %v1582_v52, %v1582_v52  ;;  %v1599_v0 = vcombine.high %v1589_v53, %v1589_v53  ;;  %v1653_v1 = vrot.slane %v1575_v44, %v4592_v35  ;;  %v2403_v44 = vld [vmem:[%s4125_s30 + $0x20] sm:$0xff] }
 0x369   : > { %v1600_v2 = vcombine.high %v1596_v60, %v1596_v60  ;;  %v1657_v3 = vrot.slane %v1589_v53, %v4592_v35  ;;  %v1661_v4 = vrot.slane %v1597_v61, %v4592_v35  ;;  %v1669_v5 = vrot.slane %v1582_v52, %v4592_v35 }
 0x36a   : > { %v1730_v6 = vmul.f32 %v1653_v1, %v1448_v45  ;;  %v1665_v7 = vrot.slane %v1599_v0, %v4592_v35  ;;  %v1673_v8 = vrot.slane %v1596_v60, %v4592_v35  ;;  %v1677_v9 = vrot.slane %v1598_v63, %v4592_v35 }
 0x36b   : > { %v4605_v10 = vpop.f32.mrb[2].mxu0  ;;  %v1731_v11 = vmul.f32 %v1657_v3, %v1448_v45  ;;  %v1732_v12 = vmul.f32 %v1661_v4, %v1448_v45  ;;  %v1734_v13 = vmul.f32 %v1669_v5, %v1448_v45  ;;  %v1681_v14 = vrot.slane %v1600_v2, %v4592_v35 }
 0x36c   : > { %3514 = vmatprep.mubr.msk.f32.mxu1 %vm1224_vm5, %v1730_v6  ;;  %v4609_v15 = vpop.f32.mrb[3].mxu0  ;;  %v1733_v16 = vmul.f32 %v1665_v7, %v1448_v45  ;;  %v1735_v17 = vmul.f32 %v1673_v8, %v1448_v45  ;;  %v1736_v18 = vmul.f32 %v1677_v9, %v1448_v45  ;;  %v1738_v20 = vmul.f32 %v1685_v50, %v1453_v41 }
 0x36d   : > { %3515 = vmatmul.mubr.msk.f32.vlgmr.msra.gmra.mrb[2].mxu1 %vm1224_vm5, %v1731_v11  ;;  %v1737_v19 = vmul.f32 %v1681_v14, %v1448_v45  ;;  %v1739_v22 = vmul.f32 %v1689_v57, %v1453_v41  ;;  %v1740_v23 = vmul.f32 %v1693_v58, %v1453_v41  ;;  %v1697_v24 = vrot.slane %v1648_v56, %v4592_v35  ;;  %v2405_v56 = vld [vmem:[%s4125_s30 + $0x30] sm:$0xff]  ;;  %v2406_v57 = vld [vmem:[%s4125_s30 + $0x38] sm:$0xff]  ;;  %s5134_s30 = sld [smem:[#allocation17_spill]] (!%p3204_p5) }
 0x36e   : > { %3517 = vmatprep.mubr.msk.f32.mxu1 %vm1224_vm5, %v1732_v12  ;;  %v1742_v25 = vmul.f32 %v1701_v59, %v1453_v41  ;;  %v1705_v26 = vrot.slane %v1645_v54, %v4592_v35  ;;  %v1709_v27 = vrot.slane %v1647_v55, %v4592_v35  ;;  %v1713_v28 = vrot.slane %v1649_v62, %v4592_v35  ;;  %v4660_v62 = vld [vmem:[%s4139_s24 + $0x2] ss:$0 sm:$0xff] }
 0x36f   : > { %v1741_v29 = vmul.f32 %v1697_v24, %v1453_v41  ;;  %v3736_v39 = vpack.c.bf16 %v2400_v37, %v2399_v36  ;;  %v3740_v46 = vpack.c.bf16 %v2402_v43, %v2401_v42  ;;  %v3744_v52 = vpack.c.bf16 %v2404_v47, %v2403_v44 }
 0x370   : > { %v1743_v30 = vmul.f32 %v1705_v26, %v1453_v41  ;;  %v1744_v31 = vmul.f32 %v1709_v27, %v1453_v41  ;;  %v1745_v32 = vmul.f32 %v1713_v28, %v1453_v41  ;;  %v3748_v3 = vpack.c.bf16 %v2406_v57, %v2405_v56 }
 0x371   : > { %3518 = vmatmul.mubr.msk.f32.gmra.mrb[4].mxu1 %vm1224_vm5, %v1733_v16  ;;  %3737 = vmatprep.subr.bf16.mxu0 %v3736_v39  ;;  %v4672_v12 = vadd.f32 %v4660_v62, %v4609_v15 }
 0x372   : > { %3520 = vmatprep.mubr.msk.f32.mxu1 %vm1224_vm5, %v1734_v13  ;;  %3739 = vmatpush3.bf16.msra.mxu0 %v3736_v39 }
 0x373   : > { %3741 = vmatprep.subr.bf16.mxu0 %v3740_v46 }
 0x375   : > { %3521 = vmatmul.mubr.msk.f32.gmra.mrb[6].mxu1 %vm1224_vm5, %v1735_v17 }
 0x376   : > { %3523 = vmatprep.mubr.msk.f32.mxu1 %vm1224_vm5, %v1736_v18  ;;  %3743 = vmatpush3.bf16.msra.mxu0 %v3740_v46 }
 0x377   : > { %3745 = vmatprep.subr.bf16.mxu0 %v3744_v52 }
 0x379   : > { %3524 = vmatmul.mubr.msk.f32.gmra.mrb[8].mxu1 %vm1224_vm5, %v1737_v19 }
 0x37a   : > { %3526 = vmatprep.mubr.msk.f32.mxu1 %vm1224_vm5, %v1738_v20  ;;  %3747 = vmatpush3.bf16.msra.mxu0 %v3744_v52 }
 0x37b   : > { %3749 = vmatprep.subr.bf16.mxu0 %v3748_v3 }
 0x37d   : > { %3527 = vmatmul.mubr.msk.f32.gmra.mrb[10].mxu1 %vm1224_vm5, %v1739_v22 }
 0x37e   : > { %3529 = vmatprep.mubr.msk.f32.mxu1 %vm1224_vm5, %v1740_v23  ;;  %3751 = vmatpush3.bf16.msra.mxu0 %v3748_v3 }
 0x381   : > { %3530 = vmatmul.mubr.msk.f32.gmra.mrb[12].mxu1 %vm1224_vm5, %v1741_v29 }
 0x382   : > { %3532 = vmatprep.mubr.msk.f32.mxu1 %vm1224_vm5, %v1742_v25 }
 0x385   : > { %3533 = vmatmul.mubr.msk.f32.gmra.mrb[14].mxu1 %vm1224_vm5, %v1743_v30 }
 0x386   : > { %3535 = vmatprep.mubr.msk.f32.mxu1 %vm1224_vm5, %v1744_v31 }
 0x389   : > { %3536 = vmatmul.mubr.msk.f32.gmra.mrb[16].mxu1 %vm1224_vm5, %v1745_v32 }
 0x440   : > { %v3516_v38 = vpop.f32.mrb[2].mxu1 }
 0x441   : > { %v4636_v40 = vadd.f32 %v3516_v38, %v4631_v34  ;;  %v1868_v41 = vpop.f32.mrb[3].mxu1 }
 0x442   : > { %v4642_v45 = vadd.f32 %v4631_v34, %v1868_v41 }
 0x443   : > { %v1974_v48 = vsel %vm1224_vm5, %v4636_v40, -inf }
 0x444   : > { %v1975_v49 = vrot.slane %v1974_v48, 4  ;;  %v1967_v50 = vsel %vm1224_vm5, %v4642_v45, -inf  ;;  %v3519_v51 = vpop.f32.mrb[4].mxu1 }
 0x445   : > { %v1968_v53 = vrot.slane %v1967_v50, 4  ;;  %v4650_v54 = vadd.f32 %v3519_v51, %v4631_v34  ;;  %v1878_v55 = vpop.f32.mrb[5].mxu1 }
 0x446   : > { %v1976_v58 = vmax.f32 %v1974_v48, %v1975_v49  ;;  %v4655_v59 = vadd.f32 %v4631_v34, %v1878_v55 }
 0x447   : > { %v1969_v60 = vmax.f32 %v1967_v50, %v1968_v53  ;;  %v1988_v61 = vsel %vm1224_vm5, %v4650_v54, -inf }
 0x448   : > { %v1977_v63 = vrot.slane %v1976_v58, 2  ;;  %v1989_v0 = vrot.slane %v1988_v61, 4  ;;  %v1981_v1 = vsel %vm1224_vm5, %v4655_v59, -inf  ;;  %v3522_v2 = vpop.f32.mrb[6].mxu1 }
 0x449   : > { %v1970_v4 = vrot.slane %v1969_v60, 2  ;;  %v1982_v5 = vrot.slane %v1981_v1, 4  ;;  %v4665_v6 = vadd.f32 %v3522_v2, %v4631_v34  ;;  %v1888_v7 = vpop.f32.mrb[7].mxu1 }
 0x44a   : > { %v1978_v8 = vmax.f32 %v1976_v58, %v1977_v63  ;;  %v1990_v9 = vmax.f32 %v1988_v61, %v1989_v0  ;;  %v4668_v11 = vadd.f32 %v4631_v34, %v1888_v7 }
 0x44b   : > { %v1971_v13 = vmax.f32 %v1969_v60, %v1970_v4  ;;  %v1983_v14 = vmax.f32 %v1981_v1, %v1982_v5  ;;  %v2002_v16 = vsel %vm1224_vm5, %v4665_v6, -inf }
 0x44c   : > { %v1979_v17 = vrot.slane %v1978_v8, 1  ;;  %v1991_v18 = vrot.slane %v1990_v9, 2  ;;  %v2003_v19 = vrot.slane %v2002_v16, 4  ;;  %v1995_v20 = vsel %vm1224_vm5, %v4668_v11, -inf  ;;  %v3525_v22 = vpop.f32.mrb[8].mxu1 }
 0x44d   : > { %v1972_v23 = vrot.slane %v1971_v13, 1  ;;  %v1984_v24 = vrot.slane %v1983_v14, 2  ;;  %v1996_v25 = vrot.slane %v1995_v20, 4  ;;  %v4679_v15 = vadd.f32 %v3525_v22, %v4631_v34  ;;  %v1898_v26 = vpop.f32.mrb[9].mxu1 }
 0x44e   : > { %v1980_v27 = vmax.f32 %v1978_v8, %v1979_v17  ;;  %v1992_v28 = vmax.f32 %v1990_v9, %v1991_v18  ;;  %v2004_v29 = vmax.f32 %v2002_v16, %v2003_v19  ;;  %v4682_v30 = vadd.f32 %v4631_v34, %v1898_v26 }
 0x44f   : > { %v1973_v31 = vmax.f32 %v1971_v13, %v1972_v23  ;;  %v1985_v32 = vmax.f32 %v1983_v14, %v1984_v24  ;;  %v1997_v33 = vmax.f32 %v1995_v20, %v1996_v25  ;;  %v2016_v36 = vsel %vm1224_vm5, %v4679_v15, -inf }
 0x450   : > { %v2080_v37 = vsub.f32 %v4636_v40, %v1980_v27  ;;  %v1993_v38 = vrot.slane %v1992_v28, 1  ;;  %v2005_v39 = vrot.slane %v2004_v29, 2  ;;  %v2017_v41 = vrot.slane %v2016_v36, 4  ;;  %v3528_v42 = vpop.f32.mrb[10].mxu1 }
 0x451   : > { %v2079_v43 = vsub.f32 %v4642_v45, %v1973_v31  ;;  %v1986_v44 = vrot.slane %v1985_v32, 1  ;;  %v1998_v46 = vrot.slane %v1997_v33, 2  ;;  %v2009_v47 = vsel %vm1224_vm5, %v4682_v30, -inf  ;;  %v1908_v48 = vpop.f32.mrb[11].mxu1 }
 0x452   : > { %v2097_v49 = vmul.f32 1.442695, %v2080_v37  ;;  %v1994_v50 = vmax.f32 %v1992_v28, %v1993_v38  ;;  %v2006_v51 = vmax.f32 %v2004_v29, %v2005_v39  ;;  %v2018_v52 = vmax.f32 %v2016_v36, %v2017_v41 }
 0x453   : > { %v2095_v53 = vmul.f32 1.442695, %v2079_v43  ;;  %v1987_v55 = vmax.f32 %v1985_v32, %v1986_v44  ;;  %v1999_v56 = vmax.f32 %v1997_v33, %v1998_v46  ;;  %v2010_v40 = vrot.slane %v2009_v47, 4 }
 0x454   : > { %3856 = vpow2.f32 %v2097_v49  ;;  %v2082_v57 = vsub.f32 %v4650_v54, %v1994_v50  ;;  %v2007_v58 = vrot.slane %v2006_v51, 1  ;;  %v2019_v60 = vrot.slane %v2018_v52, 2  ;;  %v3531_v45 = vpop.f32.mrb[12].mxu1 }
 0x455   : > { %3858 = vpow2.f32 %v2095_v53  ;;  %v2081_v61 = vsub.f32 %v4655_v59, %v1987_v55  ;;  %v2000_v63 = vrot.slane %v1999_v56, 1  ;;  %v2011_v0 = vmax.f32 %v2009_v47, %v2010_v40  ;;  %v1918_v1 = vpop.f32.mrb[13].mxu1 }
 0x456   : > { %v2101_v2 = vmul.f32 1.442695, %v2082_v57  ;;  %v2008_v3 = vmax.f32 %v2006_v51, %v2007_v58  ;;  %v2020_v4 = vmax.f32 %v2018_v52, %v2019_v60  ;;  %v4693_v5 = vadd.f32 %v3528_v42, %v4631_v34 }
 0x457   : > { %v2099_v7 = vmul.f32 1.442695, %v2081_v61  ;;  %v2001_v8 = vmax.f32 %v1999_v56, %v2000_v63  ;;  %v2012_v9 = vrot.slane %v2011_v0, 2  ;;  %v4696_v54 = vadd.f32 %v4631_v34, %v1908_v48 }
 0x458   : > { %3860 = vpow2.f32 %v2101_v2  ;;  %v2084_v13 = vsub.f32 %v4665_v6, %v2008_v3  ;;  %v2021_v14 = vrot.slane %v2020_v4, 1  ;;  %v2030_v59 = vsel %vm1224_vm5, %v4693_v5, -inf  ;;  %v3534_v16 = vpop.f32.mrb[14].mxu1 }
 0x459   : > { %3862 = vpow2.f32 %v2099_v7  ;;  %v2083_v17 = vsub.f32 %v4668_v11, %v2001_v8  ;;  %v2013_v18 = vmax.f32 %v2011_v0, %v2012_v9  ;;  %v2031_v19 = vrot.slane %v2030_v59, 4  ;;  %v4702_v20 = vpop.f32.mrb[15].mxu1 }
 0x45a   : > { %v2105_v22 = vmul.f32 1.442695, %v2084_v13  ;;  %v2022_v23 = vmax.f32 %v2020_v4, %v2021_v14  ;;  %v2023_v24 = vsel %vm1224_vm5, %v4696_v54, -inf  ;;  %v4707_v25 = vadd.f32 %v3531_v45, %v4631_v34 }
 0x45b   : > { %v2103_v6 = vmul.f32 1.442695, %v2083_v17  ;;  %v2014_v26 = vrot.slane %v2013_v18, 1  ;;  %v2032_v27 = vmax.f32 %v2030_v59, %v2031_v19  ;;  %v2024_v28 = vrot.slane %v2023_v24, 4 }
 0x45c   : > { %3864 = vpow2.f32 %v2105_v22  ;;  %v2086_v29 = vsub.f32 %v4679_v15, %v2022_v23  ;;  %v2044_v11 = vsel %vm1224_vm5, %v4707_v25, -inf  ;;  %v4713_v31 = vadd.f32 %v4631_v34, %v1918_v1  ;;  %v4715_v32 = vpop.f32.mrb[16].mxu1 }
 0x45d   : > { %3866 = vpow2.f32 %v2103_v6  ;;  %v2015_v33 = vmax.f32 %v2013_v18, %v2014_v26  ;;  %v2033_v36 = vrot.slane %v2032_v27, 2  ;;  %v2025_v37 = vmax.f32 %v2023_v24, %v2024_v28  ;;  %v4717_v38 = vpop.f32.mrb[17].mxu1 }
 0x45e   : > { %v4719_v39 = vpop.eup %3856  ;;  %v2109_v41 = vmul.f32 1.442695, %v2086_v29  ;;  %v2045_v42 = vrot.slane %v2044_v11, 4  ;;  %v2037_v15 = vsel %vm1224_vm5, %v4713_v31, -inf  ;;  %v4724_v43 = vadd.f32 %v3534_v16, %v4631_v34 }
 0x45f   : > { %v4726_v44 = vpop.eup %3858  ;;  %v2134_v46 = vsel %vm1224_vm5, %v4719_v39, 0.0  ;;  %v2085_v47 = vsub.f32 %v4682_v30, %v2015_v33  ;;  %v2034_v48 = vmax.f32 %v2032_v27, %v2033_v36  ;;  %v2026_v49 = vrot.slane %v2025_v37, 2 }
 0x460   : > { %v2135_v50 = vrot.slane %v2134_v46, 4  ;;  %v2127_v51 = vsel %vm1224_vm5, %v4726_v44, 0.0  ;;  %3868 = vpow2.f32 %v2109_v41  ;;  %v2046_v52 = vmax.f32 %v2044_v11, %v2045_v42 }
 0x461   : > { %v2128_v53 = vrot.slane %v2127_v51, 4  ;;  %v2107_v55 = vmul.f32 1.442695, %v2085_v47  ;;  %v2035_v56 = vrot.slane %v2034_v48, 1  ;;  %v2027_v40 = vmax.f32 %v2025_v37, %v2026_v49 }
 0x462   : > { %v4733_v57 = vpop.eup %3860  ;;  %v2136_v58 = vadd.f32 %v2135_v50, %v2134_v46  ;;  %v2047_v60 = vrot.slane %v2046_v52, 2  ;;  %v2038_v45 = vrot.slane %v2037_v15, 4  ;;  %v4737_v30 = vsel %vm1224_vm5, %v4724_v43, -inf }
 0x463   : > { %v4739_v61 = vpop.eup %3862  ;;  %v2129_v63 = vadd.f32 %v2128_v53, %v2127_v51  ;;  %v2148_v0 = vsel %vm1224_vm5, %v4733_v57, 0.0  ;;  %3870 = vpow2.f32 %v2107_v55  ;;  %v2036_v1 = vmax.f32 %v2034_v48, %v2035_v56 }
 0x464   : > { %v2137_v2 = vrot.slane %v2136_v58, 2  ;;  %v2149_v3 = vrot.slane %v2148_v0, 4  ;;  %v2141_v4 = vsel %vm1224_vm5, %v4739_v61, 0.0  ;;  %v2028_v7 = vrot.slane %v2027_v40, 1 }
 0x465   : > { %v2130_v8 = vrot.slane %v2129_v63, 2  ;;  %v2142_v9 = vrot.slane %v2141_v4, 4  ;;  %v2088_v13 = vsub.f32 %v4693_v5, %v2036_v1  ;;  %v2048_v14 = vmax.f32 %v2046_v52, %v2047_v60 }
 0x466   : > { %v4746_v59 = vpop.eup %3864  ;;  %v2138_v16 = vadd.f32 %v2137_v2, %v2136_v58  ;;  %v2150_v17 = vadd.f32 %v2149_v3, %v2148_v0  ;;  %v2029_v18 = vmax.f32 %v2027_v40, %v2028_v7  ;;  %v2039_v19 = vmax.f32 %v2037_v15, %v2038_v45 }
 0x467   : > { %v4748_v22 = vpop.eup %3866  ;;  %v2131_v23 = vadd.f32 %v2130_v8, %v2129_v63  ;;  %v2143_v24 = vadd.f32 %v2142_v9, %v2141_v4  ;;  %v2162_v6 = vsel %vm1224_vm5, %v4746_v59, 0.0  ;;  %v2113_v26 = vmul.f32 1.442695, %v2088_v13 }
 0x468   : > { %v2139_v27 = vrot.slane %v2138_v16, 1  ;;  %v2151_v28 = vrot.slane %v2150_v17, 2  ;;  %v2163_v29 = vrot.slane %v2162_v6, 4  ;;  %v2155_v5 = vsel %vm1224_vm5, %v4748_v22, 0.0 }
 0x469   : > { %v2132_v11 = vrot.slane %v2131_v23, 1  ;;  %v2144_v33 = vrot.slane %v2143_v24, 2  ;;  %v2156_v36 = vrot.slane %v2155_v5, 4  ;;  %3872 = vpow2.f32 %v2113_v26 }
 0x46a   : > { %v4754_v37 = vpop.eup %3868  ;;  %v2140_v41 = vadd.f32 %v2139_v27, %v2138_v16  ;;  %v2152_v42 = vadd.f32 %v2151_v28, %v2150_v17  ;;  %v2164_v15 = vadd.f32 %v2163_v29, %v2162_v6  ;;  %v2087_v46 = vsub.f32 %v4696_v54, %v2029_v18 }
 0x46b   : > { %v2133_v47 = vadd.f32 %v2132_v11, %v2131_v23  ;;  %v2145_v48 = vadd.f32 %v2144_v33, %v2143_v24  ;;  %v2157_v49 = vadd.f32 %v2156_v36, %v2155_v5  ;;  %v2176_v50 = vsel %vm1224_vm5, %v4754_v37, 0.0 }
 0x46c   : > { %3874 = vrcp.f32 %v2140_v41  ;;  %v2153_v51 = vrot.slane %v2152_v42, 1  ;;  %v2165_v52 = vrot.slane %v2164_v15, 2  ;;  %v2177_v53 = vrot.slane %v2176_v50, 4 }
 0x46d   : > { %v4759_v55 = vpop.eup %3870  ;;  %3876 = vrcp.f32 %v2133_v47  ;;  %v2146_v56 = vrot.slane %v2145_v48, 1  ;;  %v2158_v40 = vrot.slane %v2157_v49, 2  ;;  %v2111_v58 = vmul.f32 1.442695, %v2087_v46 }
 0x46e   : > { %v2154_v60 = vadd.f32 %v2153_v51, %v2152_v42  ;;  %v2166_v45 = vadd.f32 %v2165_v52, %v2164_v15  ;;  %v2178_v63 = vadd.f32 %v2177_v53, %v2176_v50  ;;  %v2169_v54 = vsel %vm1224_vm5, %v4759_v55, 0.0 }
 0x46f   : > { %v2147_v0 = vadd.f32 %v2146_v56, %v2145_v48  ;;  %v2159_v1 = vadd.f32 %v2158_v40, %v2157_v49  ;;  %v2170_v2 = vrot.slane %v2169_v54, 4  ;;  %3878 = vpow2.f32 %v2111_v58 }
 0x470   : > { %3880 = vrcp.f32 %v2154_v60  ;;  %v2167_v3 = vrot.slane %v2166_v45, 1  ;;  %v2179_v4 = vrot.slane %v2178_v63, 2  ;;  %v2049_v7 = vrot.slane %v2048_v14, 1 }
 0x471   : > { %3882 = vrcp.f32 %v2147_v0  ;;  %v2160_v8 = vrot.slane %v2159_v1, 1  ;;  %v2171_v9 = vadd.f32 %v2170_v2, %v2169_v54  ;;  %v2040_v13 = vrot.slane %v2039_v19, 2 }
 0x472   : > { %v2168_v16 = vadd.f32 %v2167_v3, %v2166_v45  ;;  %v2180_v17 = vadd.f32 %v2179_v4, %v2178_v63  ;;  %v2050_v18 = vmax.f32 %v2048_v14, %v2049_v7  ;;  %v2059_v23 = vrot.slane %v4737_v30, 4 }
 0x473   : > { %v4764_v24 = vpop.eup %3872  ;;  %v2161_v6 = vadd.f32 %v2160_v8, %v2159_v1  ;;  %v2172_v26 = vrot.slane %v2171_v9, 2  ;;  %v2041_v27 = vmax.f32 %v2039_v19, %v2040_v13  ;;  %v4768_v28 = vadd.f32 %v4631_v34, %v4702_v20 }
 0x474   : > { %3884 = vrcp.f32 %v2168_v16  ;;  %v2181_v29 = vrot.slane %v2180_v17, 1  ;;  %v2190_v5 = vsel %vm1224_vm5, %v4764_v24, 0.0  ;;  %v2090_v11 = vsub.f32 %v4707_v25, %v2050_v18 }
 0x475   : > { %3886 = vrcp.f32 %v2161_v6  ;;  %v2173_v14 = vadd.f32 %v2172_v26, %v2171_v9  ;;  %v2191_v33 = vrot.slane %v2190_v5, 4  ;;  %v2042_v36 = vrot.slane %v2041_v27, 1 }
 0x476   : > { %v3875_v41 = vpop.eup %3874  ;;  %v2182_v42 = vadd.f32 %v2181_v29, %v2180_v17  ;;  %v2117_v15 = vmul.f32 1.442695, %v2090_v11  ;;  %v2060_v19 = vmax.f32 %v4737_v30, %v2059_v23  ;;  %v4776_v20 = vsel %vm1224_vm5, %v4768_v28, -inf }
 0x477   : > { %v3877_v46 = vpop.eup %3876  ;;  %v2242_v47 = vmul.f32 %v3875_v41, %v4719_v39  ;;  %v2174_v48 = vrot.slane %v2173_v14, 1  ;;  %v2192_v49 = vadd.f32 %v2191_v33, %v2190_v5  ;;  %v2043_v50 = vmax.f32 %v2041_v27, %v2042_v36 }
 0x478   : > { %v2240_v25 = vmul.f32 %v3877_v46, %v4726_v44  ;;  %3888 = vrcp.f32 %v2182_v42  ;;  %v2061_v51 = vrot.slane %v2060_v19, 2  ;;  %v2052_v52 = vrot.slane %v4776_v20, 4 }
 0x479   : > { %v4781_v53 = vpop.eup %3878  ;;  %v2272_v30 = vmul.f32 %v2242_v47, %v4672_v12  ;;  %v2175_v56 = vadd.f32 %v2174_v48, %v2173_v14  ;;  %v2193_v40 = vrot.slane %v2192_v49, 2  ;;  %3890 = vpow2.f32 %v2117_v15 }
 0x47a   : > { %v3881_v58 = vpop.eup %3880  ;;  %v2271_v60 = vmul.f32 %v2240_v25, %v4672_v12  ;;  %v2183_v39 = vsel %vm1224_vm5, %v4781_v53, 0.0  ;;  %v2089_v45 = vsub.f32 %v4713_v31, %v2043_v50  ;;  %v2062_v44 = vmax.f32 %v2060_v19, %v2061_v51 }
 0x47b   : > { %v3883_v63 = vpop.eup %3882  ;;  %v2294_v54 = vsel %vm1224_vm5, %v2272_v30, 0.0  ;;  %v2246_v0 = vmul.f32 %v3881_v58, %v4733_v57  ;;  %3892 = vrcp.f32 %v2175_v56  ;;  %v2194_v1 = vadd.f32 %v2193_v40, %v2192_v49 }
 0x47c   : > { %v2295_v2 = vrot.slane %v2294_v54, 4  ;;  %v2287_v3 = vsel %vm1224_vm5, %v2271_v60, 0.0  ;;  %v2244_v4 = vmul.f32 %v3883_v63, %v4739_v61  ;;  %v2184_v7 = vrot.slane %v2183_v39, 4 }
 0x47d   : > { %v2288_v8 = vrot.slane %v2287_v3, 4  ;;  %v2274_v9 = vmul.f32 %v2246_v0, %v4672_v12  ;;  %v2195_v13 = vrot.slane %v2194_v1, 1  ;;  %v2115_v16 = vmul.f32 1.442695, %v2089_v45 }
 0x47e   : > { %v3885_v31 = vpop.eup %3884  ;;  %v2296_v17 = vadd.f32 %v2295_v2, %v2294_v54  ;;  %v2273_v18 = vmul.f32 %v2244_v4, %v4672_v12  ;;  %v2185_v23 = vadd.f32 %v2184_v7, %v2183_v39  ;;  %v2063_v6 = vrot.slane %v2062_v44, 1 }
 0x47f   : > { %v3887_v57 = vpop.eup %3886  ;;  %v2289_v26 = vadd.f32 %v2288_v8, %v2287_v3  ;;  %v2308_v27 = vsel %vm1224_vm5, %v2274_v9, 0.0  ;;  %v2250_v29 = vmul.f32 %v3885_v31, %v4746_v59  ;;  %v2196_v5 = vadd.f32 %v2195_v13, %v2194_v1 }
 0x480   : > { %v2297_v61 = vrot.slane %v2296_v17, 2  ;;  %v2309_v11 = vrot.slane %v2308_v27, 4  ;;  %v2301_v14 = vsel %vm1224_vm5, %v2273_v18, 0.0  ;;  %v2248_v33 = vmul.f32 %v3887_v57, %v4748_v22 }
 0x481   : > { %v2290_v36 = vrot.slane %v2289_v26, 2  ;;  %v2302_v41 = vrot.slane %v2301_v14, 4  ;;  %v4799_v42 = vmul.f32 %v2250_v29, %v4672_v12  ;;  %3894 = vrcp.f32 %v2196_v5 }
 0x482   : > { %v3889_v15 = vpop.eup %3888  ;;  %v4803_v19 = vadd.f32 %v4605_v10, %v4660_v62  ;;  %v4805_v46 = vadd.f32 %v2297_v61, %v2296_v17  ;;  %v2275_v59 = vmul.f32 %v2248_v33, %v4672_v12  ;;  %v2186_v47 = vrot.slane %v2185_v23, 2 }
 0x483   : > { %v4808_v48 = vpop.eup %3890  ;;  %v2310_v49 = vadd.f32 %v2309_v11, %v2308_v27  ;;  %v2303_v22 = vadd.f32 %v2302_v41, %v2301_v14  ;;  %v2254_v50 = vmul.f32 %v3889_v15, %v4754_v37  ;;  %3896 = vpow2.f32 %v2115_v16 }
 0x484   : > { %v2291_v25 = vadd.f32 %v2290_v36, %v2289_v26  ;;  %v2187_v51 = vadd.f32 %v2186_v47, %v2185_v23  ;;  %v2204_v30 = vsel %vm1224_vm5, %v4808_v48, 0.0  ;;  %v2064_v56 = vmax.f32 %v2062_v44, %v2063_v6 }
 0x485   : > { %v3893_v10 = vpop.eup %3892  ;;  %v2304_v62 = vrot.slane %v2303_v22, 2  ;;  %v2315_v40 = vsel %vm1224_vm5, %v2275_v59, 0.0  ;;  %v2205_v58 = vrot.slane %v2204_v30, 4  ;;  %v2053_v60 = vmax.f32 %v4776_v20, %v2052_v52 }
 0x486   : > { %v2252_v39 = vmul.f32 %v3893_v10, %v4759_v55  ;;  %v2188_v45 = vrot.slane %v2187_v51, 1  ;;  %v2092_v63 = vsub.f32 %v4724_v43, %v2064_v56  ;;  %v4819_v37 = vadd.f32 %v4715_v32, %v4631_v34 }
 0x487   : > { %v2206_v54 = vadd.f32 %v2205_v58, %v2204_v30  ;;  %v2054_v0 = vrot.slane %v2053_v60, 2  ;;  %v4823_v44 = vadd.f32 %v4631_v34, %v4717_v38  ;;  %v4826_v1 = vmul.f32 %v2254_v50, %v4672_v12 }
 0x488   : > { %v4829_v20 = vmul.f32 %v2252_v39, %v4672_v12  ;;  %v2189_v55 = vadd.f32 %v2188_v45, %v2187_v51  ;;  %v2121_v52 = vmul.f32 1.442695, %v2092_v63  ;;  %v2072_v43 = vsel %vm1224_vm5, %v4819_v37, -inf }
 0x489   : > { %v2207_v2 = vrot.slane %v2206_v54, 2  ;;  %v2055_v32 = vmax.f32 %v2053_v60, %v2054_v0  ;;  %v2073_v3 = vrot.slane %v2072_v43, 4  ;;  %v2065_v4 = vsel %vm1224_vm5, %v4823_v44, -inf }
 0x48a   : > { %v2316_v7 = vrot.slane %v2315_v40, 4  ;;  %3898 = vrcp.f32 %v2189_v55  ;;  %v2066_v34 = vrot.slane %v2065_v4, 4  ;;  %v2292_v38 = vrot.slane %v2291_v25, 1 }
 0x48b   : > { %v3895_v8 = vpop.eup %3894  ;;  %v2208_v9 = vadd.f32 %v2207_v2, %v2206_v54  ;;  %3900 = vpow2.f32 %v2121_v52  ;;  %v2056_v12 = vrot.slane %v2055_v32, 1  ;;  %v2074_v13 = vmax.f32 %v2072_v43, %v2073_v3 }
 0x48c   : > { %v2258_v16 = vmul.f32 %v3895_v8, %v4764_v24  ;;  %v2067_v31 = vmax.f32 %v2065_v4, %v2066_v34  ;;  %v4836_v17 = vadd.f32 %v2292_v38, %v2291_v25  ;;  %v2299_v18 = vrot.slane %v4805_v46, 1 }
 0x48d   : > { %v4839_v23 = vpop.eup %3896  ;;  %v2209_v6 = vrot.slane %v2208_v9, 1  ;;  %v2057_v57 = vmax.f32 %v2055_v32, %v2056_v12  ;;  %v2075_v26 = vrot.slane %v2074_v13, 2  ;;  %v2305_v27 = vadd.f32 %v2304_v62, %v2303_v22 }
 0x48e   : > { %v2280_v29 = vmul.f32 %v2258_v16, %v4803_v19  ;;  %v2197_v5 = vsel %vm1224_vm5, %v4839_v23, 0.0  ;;  %v2068_v61 = vrot.slane %v2067_v31, 2  ;;  %v2311_v11 = vrot.slane %v2310_v49, 2 }
 0x48f   : > { %v2210_v14 = vadd.f32 %v2209_v6, %v2208_v9  ;;  %v2198_v24 = vrot.slane %v2197_v5, 4  ;;  %v2091_v33 = vsub.f32 %v4768_v28, %v2057_v57  ;;  %v2076_v36 = vmax.f32 %v2074_v13, %v2075_v26 }
 0x490   : > { %v2350_v41 = vsel %vm1224_vm5, %v2280_v29, 0.0  ;;  %v2069_v15 = vmax.f32 %v2067_v31, %v2068_v61  ;;  %v2306_v59 = vrot.slane %v2305_v27, 1  ;;  %v2312_v47 = vadd.f32 %v2311_v11, %v2310_v49 }
 0x491   : > { %v2351_v50 = vrot.slane %v2350_v41, 4  ;;  %3902 = vrcp.f32 %v2210_v14  ;;  %v2199_v22 = vadd.f32 %v2198_v24, %v2197_v5  ;;  %v2119_v25 = vmul.f32 1.442695, %v2091_v33 }
 0x492   : > { %v2077_v51 = vrot.slane %v2076_v36, 1  ;;  %v2070_v30 = vrot.slane %v2069_v15, 1  ;;  %v4847_v56 = vadd.f32 %v2299_v18, %v4805_v46  ;;  %v4849_v10 = vadd.f32 %v2306_v59, %v2305_v27 }
 0x493   : > { %v2352_v62 = vadd.f32 %v2351_v50, %v2350_v41  ;;  %v2200_v58 = vrot.slane %v2199_v22, 2  ;;  %3904 = vpow2.f32 %v2119_v25  ;;  %v2317_v28 = vadd.f32 %v2316_v7, %v2315_v40 }
 0x494   : > { %v3899_v60 = vpop.eup %3898  ;;  %v2078_v39 = vmax.f32 %v2076_v36, %v2077_v51  ;;  %v2071_v45 = vmax.f32 %v2069_v15, %v2070_v30  ;;  %v2313_v63 = vrot.slane %v2312_v47, 1  ;;  %v2322_v49 = vsel %vm1224_vm5, %v4799_v42, 0.0 }
 0x495   : > { %v4853_v54 = vpop.eup %3900  ;;  %v2353_v0 = vrot.slane %v2352_v62, 2  ;;  %v2256_v55 = vmul.f32 %v3899_v60, %v4781_v53  ;;  %v2201_v46 = vadd.f32 %v2200_v58, %v2199_v22  ;;  %v2318_v52 = vrot.slane %v2317_v28, 2 }
 0x496   : > { %v2218_v43 = vsel %vm1224_vm5, %v4853_v54, 0.0  ;;  %v2094_v40 = vsub.f32 %v4819_v37, %v2078_v39  ;;  %v2093_v2 = vsub.f32 %v4823_v44, %v2071_v45  ;;  %v2323_v32 = vrot.slane %v2322_v49, 4 }
 0x497   : > { %v2354_v3 = vadd.f32 %v2353_v0, %v2352_v62  ;;  %v2279_v4 = vmul.f32 %v2256_v55, %v4803_v19  ;;  %v2202_v42 = vrot.slane %v2201_v46, 1  ;;  %v2219_v7 = vrot.slane %v2218_v43, 4 }
 0x498   : > { %v2125_v34 = vmul.f32 1.442695, %v2094_v40  ;;  %v2123_v38 = vmul.f32 1.442695, %v2093_v2  ;;  %v2319_v53 = vadd.f32 %v2318_v52, %v2317_v28  ;;  %v2324_v8 = vadd.f32 %v2323_v32, %v2322_v49 }
 0x499   : > { %v2343_v9 = vsel %vm1224_vm5, %v2279_v4, 0.0  ;;  %v2203_v12 = vadd.f32 %v2202_v42, %v2201_v46  ;;  %v2220_v13 = vadd.f32 %v2219_v7, %v2218_v43  ;;  %v2314_v16 = vadd.f32 %v2313_v63, %v2312_v47 }
 0x49a   : > { %v2344_v37 = vrot.slane %v2343_v9, 4  ;;  %3906 = vpow2.f32 %v2125_v34  ;;  %v2320_v44 = vrot.slane %v2319_v53, 1  ;;  %v2325_v31 = vrot.slane %v2324_v8, 2 }
 0x49b   : > { %v3903_v18 = vpop.eup %3902  ;;  %v2355_v6 = vrot.slane %v2354_v3, 1  ;;  %3908 = vrcp.f32 %v2203_v12  ;;  %v2221_v57 = vrot.slane %v2220_v13, 2  ;;  %v2329_v26 = vsel %vm1224_vm5, %v4829_v20, 0.0 }
 0x49c   : > { %v2345_v27 = vadd.f32 %v2344_v37, %v2343_v9  ;;  %v2262_v29 = vmul.f32 %v3903_v18, %v4808_v48  ;;  %3910 = vpow2.f32 %v2123_v38  ;;  %v2321_v5 = vadd.f32 %v2320_v44, %v2319_v53 }
 0x49d   : > { %v4865_v61 = vpop.eup %3904  ;;  %v2222_v11 = vadd.f32 %v2221_v57, %v2220_v13  ;;  %v2326_v14 = vadd.f32 %v2325_v31, %v2324_v8  ;;  %v2330_v24 = vrot.slane %v2329_v26, 4  ;;  %v2336_v33 = vsel %vm1224_vm5, %v4826_v1, 0.0 }
 0x49e   : > { %v2346_v36 = vrot.slane %v2345_v27, 2  ;;  %v2282_v41 = vmul.f32 %v2262_v29, %v4803_v19  ;;  %v2211_v15 = vsel %vm1224_vm5, %v4865_v61, 0.0  ;;  %v2337_v20 = vrot.slane %v2336_v33, 4 }
 0x49f   : > { %v2223_v59 = vrot.slane %v2222_v11, 1  ;;  %v2212_v47 = vrot.slane %v2211_v15, 4  ;;  %v2327_v48 = vrot.slane %v2326_v14, 1  ;;  %v2331_v50 = vadd.f32 %v2330_v24, %v2329_v26 }
 0x4a0   : > { %v2347_v22 = vadd.f32 %v2346_v36, %v2345_v27  ;;  %v2364_v25 = vsel %vm1224_vm5, %v2282_v41, 0.0  ;;  %v2338_v51 = vadd.f32 %v2337_v20, %v2336_v33  ;;  %v2431_v1 = vsel %vm2430_vm7, %v4847_v56, %v4836_v17 }
 0x4a1   : > { %v2356_v30 = vadd.f32 %v2355_v6, %v2354_v3  ;;  %v2365_v62 = vrot.slane %v2364_v25, 4  ;;  %v2224_v58 = vadd.f32 %v2223_v59, %v2222_v11  ;;  %v2213_v28 = vadd.f32 %v2212_v47, %v2211_v15 }
 0x4a2   : > { %v2348_v60 = vrot.slane %v2347_v22, 1  ;;  %v2332_v39 = vrot.slane %v2331_v50, 2  ;;  %v2339_v45 = vrot.slane %v2338_v51, 2  ;;  %v2433_v63 = vsel %vm2432_vm8, %v4849_v10, %v2431_v1 }
 0x4a3   : > { %3912 = vrcp.f32 %v2224_v58  ;;  %v2214_v49 = vrot.slane %v2213_v28, 2  ;;  %v2328_v0 = vadd.f32 %v2327_v48, %v2326_v14  ;;  %v2435_v55 = vsel %vm2434_vm9, %v2314_v16, %v2433_v63 }
 0x4a4   : > { %v4879_v46 = vpop.eup %3906  ;;  %v2349_v52 = vadd.f32 %v2348_v60, %v2347_v22  ;;  %v2333_v43 = vadd.f32 %v2332_v39, %v2331_v50  ;;  %v2340_v17 = vadd.f32 %v2339_v45, %v2338_v51  ;;  %v2437_v56 = vsel %vm2436_vm10, %v2321_v5, %v2435_v55 }
 0x4a5   : > { %v3909_v40 = vpop.eup %3908  ;;  %v2366_v2 = vadd.f32 %v2365_v62, %v2364_v25  ;;  %v2215_v32 = vadd.f32 %v2214_v49, %v2213_v28  ;;  %v2232_v3 = vsel %vm1224_vm5, %v4879_v46, 0.0  ;;  %v2439_v10 = vsel %vm2438_vm11, %v2328_v0, %v2437_v56 }
 0x4a6   : > { %v3911_v4 = vpop.eup %3910  ;;  %v2260_v42 = vmul.f32 %v3909_v40, %v4839_v23  ;;  %v2233_v7 = vrot.slane %v2232_v3, 4  ;;  %v2334_v34 = vrot.slane %v2333_v43, 1  ;;  %v2341_v38 = vrot.slane %v2340_v17, 1 }
 0x4a7   : > { %v2216_v53 = vrot.slane %v2215_v32, 1  ;;  %v2225_v8 = vsel %vm1224_vm5, %v3911_v4, 0.0  ;;  %v2444_v9 = vsel %vm2430_vm7, %v2356_v30, %v2349_v52  ;;  %v2367_v44 = vrot.slane %v2366_v2, 2 }
 0x4a8   : > { %v2281_v12 = vmul.f32 %v2260_v42, %v4803_v19  ;;  %v2234_v13 = vadd.f32 %v2233_v7, %v2232_v3  ;;  %v2226_v16 = vrot.slane %v2225_v8, 4  ;;  %v2335_v37 = vadd.f32 %v2334_v34, %v2333_v43 }
 0x4a9   : > { %v2217_v31 = vadd.f32 %v2216_v53, %v2215_v32  ;;  %v2342_v18 = vadd.f32 %v2341_v38, %v2340_v17  ;;  %v2368_v15 = vadd.f32 %v2367_v44, %v2366_v2 }
 0x4aa   : > { %v2357_v6 = vsel %vm1224_vm5, %v2281_v12, 0.0  ;;  %v2235_v23 = vrot.slane %v2234_v13, 2  ;;  %v2227_v57 = vadd.f32 %v2226_v16, %v2225_v8  ;;  %v2441_v26 = vsel %vm2440_vm12, %v2335_v37, %v2439_v10 }
 0x4ab   : > { %v2358_v27 = vrot.slane %v2357_v6, 4  ;;  %3914 = vrcp.f32 %v2217_v31  ;;  %v2443_v29 = vsel %vm2442_vm13, %v2342_v18, %v2441_v26  ;;  %v2369_v51 = vrot.slane %v2368_v15, 1 }
 0x4ac   : > { %v2236_v5 = vadd.f32 %v2235_v23, %v2234_v13  ;;  %v2228_v11 = vrot.slane %v2227_v57, 2  ;;  %3554 = vmatprep.mubr.msk.f32.mxu0 %vm1224_vm5, %v2443_v29  ;;  %v3196_v29 = vld [vmem:[%s5129_s5] ss:$0 sm:$0xff] }
 0x4ad   : > { %v3913_v14 = vpop.eup %3912  ;;  %v2359_v24 = vadd.f32 %v2358_v27, %v2357_v6  ;;  %v2370_v28 = vadd.f32 %v2369_v51, %v2368_v15 }
 0x4ae   : > { %v2266_v33 = vmul.f32 %v3913_v14, %v4853_v54  ;;  %v2237_v36 = vrot.slane %v2236_v5, 1  ;;  %v2229_v41 = vadd.f32 %v2228_v11, %v2227_v57 }
 0x4af   : > { %v2360_v20 = vrot.slane %v2359_v24, 2 }
 0x4b0   : > { %v2284_v59 = vmul.f32 %v2266_v33, %v4803_v19  ;;  %v2238_v47 = vadd.f32 %v2237_v36, %v2236_v5  ;;  %v2230_v48 = vrot.slane %v2229_v41, 1  ;;  %v3932_v33 = vld [vmem:[#allocation2 + $0x8] sm:$0xff] }
 0x4b1   : > { %v2361_v50 = vadd.f32 %v2360_v20, %v2359_v24 }
 0x4b2   : > { %v2378_v22 = vsel %vm1224_vm5, %v2284_v59, 0.0  ;;  %3916 = vrcp.f32 %v2238_v47  ;;  %v2231_v25 = vadd.f32 %v2230_v48, %v2229_v41  ;;  %v3933_v41 = vld [vmem:[#allocation2] sm:$0xff] }
 0x4b3   : > { %v2379_v1 = vrot.slane %v2378_v22, 4  ;;  %v2362_v30 = vrot.slane %v2361_v50, 1 }
 0x4b4   : > { %3918 = vrcp.f32 %v2231_v25 }
 0x4b5   : > { %v3915_v62 = vpop.eup %3914  ;;  %v2363_v58 = vadd.f32 %v2362_v30, %v2361_v50  ;;  %v2380_v60 = vadd.f32 %v2379_v1, %v2378_v22 }
 0x4b6   : > { %v2264_v54 = vmul.f32 %v3915_v62, %v4865_v61 }
 0x4b7   : > { %v2445_v39 = vsel %vm2432_vm8, %v2363_v58, %v2444_v9  ;;  %v2381_v0 = vrot.slane %v2380_v60, 2 }
 0x4b8   : > { %v2283_v45 = vmul.f32 %v2264_v54, %v4803_v19  ;;  %v2446_v63 = vsel %vm2434_vm9, %v2370_v28, %v2445_v39  ;;  %v2577_v54 = vld [vmem:[%s4153_s8 + $0x8] sm:$0xff]  ;;  %v2579_v28 = vld [vmem:[%s4153_s8 + $0x18] sm:$0xff]  ;;  %v2576_v39 = vld [vmem:[%s4153_s8] sm:$0xff] }
 0x4b9   : > { %v2382_v40 = vadd.f32 %v2381_v0, %v2380_v60  ;;  %v3752_v60 = vpack.c.bf16 %v2579_v28, %v2577_v54  ;;  %v2583_v0 = vld [vmem:[%s4153_s8 + $0x38] sm:$0xff] }
 0x4ba   : > { %v2371_v49 = vsel %vm1224_vm5, %v2283_v45, 0.0  ;;  %v2578_v45 = vld [vmem:[%s4153_s8 + $0x10] sm:$0xff] }
 0x4bb   : > { %v2372_v55 = vrot.slane %v2371_v49, 4  ;;  %v2383_v7 = vrot.slane %v2382_v40, 1  ;;  %3753 = vmatprep.subr.bf16.mxu0 %v3752_v60  ;;  %v2713_v60 = vld [vmem:[%s4165_s19 + $0x30] sm:$0xff] }
 0x4bc   : > { %v3917_v52 = vpop.eup %3916 }
 0x4bd   : > { %v2373_v43 = vadd.f32 %v2372_v55, %v2371_v49  ;;  %v2270_v17 = vmul.f32 %v3917_v52, %v4879_v46  ;;  %v2384_v46 = vadd.f32 %v2383_v7, %v2382_v40  ;;  %v2581_v49 = vld [vmem:[%s4153_s8 + $0x28] sm:$0xff]  ;;  %v2580_v52 = vld [vmem:[%s4153_s8 + $0x20] sm:$0xff]  ;;  %v2587_v40 = vld [vmem:[%s4153_s8 + $0x58] sm:$0xff] }
 0x4be   : > { %v3919_v56 = vpop.eup %3918  ;;  %v3756_v55 = vpack.c.bf16 %v2583_v0, %v2581_v49  ;;  %v2732_v49 = vld [vmem:[%s4165_s19 + $0xc8] sm:$0xff] }
 0x4bf   : > { %v2286_v61 = vmul.f32 %v2270_v17, %v4803_v19  ;;  %v2268_v2 = vmul.f32 %v3919_v56, %v3911_v4  ;;  %v2374_v32 = vrot.slane %v2373_v43, 2  ;;  %v2585_v56 = vld [vmem:[%s4153_s8 + $0x48] sm:$0xff] }
 0x4c1   : > { %v2285_v3 = vmul.f32 %v2268_v2, %v4803_v19  ;;  %v2375_v10 = vadd.f32 %v2374_v32, %v2373_v43  ;;  %v2392_v42 = vsel %vm1224_vm5, %v2286_v61, 0.0  ;;  %v2582_v43 = vld [vmem:[%s4153_s8 + $0x30] sm:$0xff]  ;;  %v3760_v61 = vpack.c.bf16 %v2587_v40, %v2585_v56  ;;  %v2584_v2 = vld [vmem:[%s4153_s8 + $0x40] sm:$0xff]  ;;  %v2734_v56 = vld [vmem:[%s4165_s19 + $0xd8] sm:$0xff] }
 0x4c2   : > { %v2393_v34 = vrot.slane %v2392_v42, 4  ;;  %v3758_v17 = vpack.c.bf16 %v2582_v43, %v2580_v52  ;;  %v2586_v32 = vld [vmem:[%s4153_s8 + $0x50] sm:$0xff]  ;;  %v2716_v52 = vld [vmem:[%s4165_s19 + $0x48] sm:$0xff] }
 0x4c3   : > { %v2376_v38 = vrot.slane %v2375_v10, 1  ;;  %v2385_v53 = vsel %vm1224_vm5, %v2285_v3, 0.0  ;;  %v3762_v3 = vpack.c.bf16 %v2586_v32, %v2584_v2  ;;  %v2718_v2 = vld [vmem:[%s4165_s19 + $0x58] sm:$0xff] }
 0x4c4   : > { %v2386_v8 = vrot.slane %v2385_v53, 4  ;;  %v2394_v9 = vadd.f32 %v2393_v34, %v2392_v42  ;;  %v2591_v42 = vld [vmem:[%s4153_s8 + $0x78] sm:$0xff]  ;;  %v2588_v34 = vld [vmem:[%s4153_s8 + $0x60] sm:$0xff] }
 0x4c5   : > { %v2377_v12 = vadd.f32 %v2376_v38, %v2375_v10  ;;  %v2589_v10 = vld [vmem:[%s4153_s8 + $0x68] sm:$0xff]  ;;  %v2590_v38 = vld [vmem:[%s4153_s8 + $0x70] sm:$0xff] }
 0x4c6   : > { %v2387_v13 = vadd.f32 %v2386_v8, %v2385_v53  ;;  %v2395_v16 = vrot.slane %v2394_v9, 2  ;;  %v3764_v7 = vpack.c.bf16 %v2591_v42, %v2589_v10  ;;  %v3766_v53 = vpack.c.bf16 %v2590_v38, %v2588_v34  ;;  %v2736_v10 = vld [vmem:[%s4165_s19 + $0xe8] sm:$0xff] }
 0x4c7   : > { %v2447_v4 = vsel %vm2436_vm10, %v2377_v12, %v2446_v63  ;;  %v3754_v63 = vpack.c.bf16 %v2578_v45, %v2576_v39  ;;  %v3977_v8 = vmov 0.0   ;;  %v2724_v12 = vld [vmem:[%s4165_s19 + $0x88] sm:$0xff]  ;;  %v2714_v39 = vld [vmem:[%s4165_s19 + $0x38] sm:$0xff] }
 0x4c8   : > { %v2388_v37 = vrot.slane %v2387_v13, 2  ;;  %v2396_v44 = vadd.f32 %v2395_v16, %v2394_v9  ;;  %v2448_v19 = vsel %vm2438_vm11, %v2384_v46, %v2447_v4  ;;  %v2723_v9 = vld [vmem:[%s4165_s19 + $0x80] sm:$0xff]  ;;  %v2708_v16 = vld [vmem:[%s4165_s19 + $0x8] sm:$0xff]  ;;  %v2725_v4 = vld [vmem:[%s4165_s19 + $0x90] sm:$0xff]  ;;  %v3782_v45 = vpack.c.bf16 %v2714_v39, %v2713_v60 }
 0x4c9   : > { %v2707_v46 = vld [vmem:[%s4165_s19] sm:$0xff]  ;;  %v2720_v34 = vld [vmem:[%s4165_s19 + $0x68] sm:$0xff] }
 0x4ca   : > { %v2389_v31 = vadd.f32 %v2388_v37, %v2387_v13  ;;  %v2397_v18 = vrot.slane %v2396_v44, 1  ;;  %v3768_v13 = vpack.c.bf16 %v2724_v12, %v2723_v9  ;;  %v2726_v37 = vld [vmem:[%s4165_s19 + $0x98] sm:$0xff]  ;;  %v2721_v12 = vld [vmem:[%s4165_s19 + $0x70] sm:$0xff] }
 0x4cc   : > { %v2390_v6 = vrot.slane %v2389_v31, 1  ;;  %v2398_v57 = vadd.f32 %v2397_v18, %v2396_v44  ;;  %v3770_v44 = vpack.c.bf16 %v2708_v16, %v2707_v46  ;;  %v2710_v18 = vld [vmem:[%s4165_s19 + $0x18] sm:$0xff]  ;;  %3769 = vmatprep.subr.bf16.mxu1 %v3768_v13  ;;  %v2592_v16 = vld [vmem:[%s4159_s26] sm:$0x3] }
 0x4cd   : > { %v2722_v46 = vld [vmem:[%s4165_s19 + $0x78] sm:$0xff] }
 0x4ce   : > { %v2391_v23 = vadd.f32 %v2390_v6, %v2389_v31  ;;  %v2709_v31 = vld [vmem:[%s4165_s19 + $0x10] sm:$0xff]  ;;  %v2727_v6 = vld [vmem:[%s4165_s19 + $0xa0] sm:$0xff]  ;;  %3771 = vmatpush3.bf16.msra.mxu1 %v3770_v44  ;;  %v3798_v13 = vpack.c.bf16 %v2722_v46, %v2721_v12  ;;  %v2885_v12 = vld [vmem:[%s5094_s20 + $0x18] sm:$0xff] (!%p3204_p5)  ;;  %v3980_v46 = vmov (!%p3204_p5), 0.0  }
 0x4d0   : > { %v2449_v26 = vsel %vm2440_vm12, %v2391_v23, %v2448_v19  ;;  %v3772_v19 = vpack.c.bf16 %v2726_v37, %v2725_v4  ;;  %v2728_v23 = vld [vmem:[%s4165_s19 + $0xa8] sm:$0xff]  ;;  %v2600_v4 = vsub.s32 1, %v4586_v21  ;;  %v2597_v37 = vrot.slane %v2592_v16, %v4592_v35 }
 0x4d1   : > { %v2450_v27 = vsel %vm2442_vm13, %v2398_v57, %v2449_v26  ;;  %v3774_v57 = vpack.c.bf16 %v2710_v18, %v2709_v31  ;;  %v3776_v26 = vpack.c.bf16 %v2728_v23, %v2727_v6 }
 0x4d2   : > { %3555 = vmatmul.mubr.msk.f32.vlgmr.msra.gmra.mrb[4].mxu0 %vm1224_vm5, %v2450_v27  ;;  %3773 = vmatprep.subr.bf16.mxu1 %v3772_v19  ;;  %v2711_v27 = vld [vmem:[%s4165_s19 + $0x20] sm:$0xff]  ;;  %v2601_v44 = vrot.slane %v2592_v16, %v2600_v4  ;;  %v2887_v4 = vld [vmem:[%s5094_s20 + $0x28] sm:$0xff] (!%p3204_p5) }
 0x4d3   : > { %3755 = vmatpush1.bf16.msra.mxu0 %v3754_v63  ;;  %2674 = vmatprep.mubr.f32.mxu0 %v3977_v8  ;;  %v2731_v63 = vld [vmem:[%s4165_s19 + $0xc0] sm:$0xff] }
 0x4d4   : > { %3757 = vmatprep.subr.bf16.mxu0 %v3756_v55  ;;  %3775 = vmatpush3.bf16.msra.mxu1 %v3774_v57  ;;  %v3784_v0 = vpack.c.bf16 %v2732_v49, %v2731_v63  ;;  %v2715_v55 = vld [vmem:[%s4165_s19 + $0x40] sm:$0xff] }
 0x4d5   : > { %3777 = vmatprep.subr.bf16.mxu1 %v3776_v26  ;;  %v3786_v43 = vpack.c.bf16 %v2716_v52, %v2715_v55  ;;  %v2886_v16 = vld [vmem:[%s5094_s20 + $0x20] sm:$0xff] (!%p3204_p5) }
 0x4d7   : > { %3759 = vmatpush1.bf16.msra.mxu0 %v3758_v17  ;;  %v2733_v17 = vld [vmem:[%s4165_s19 + $0xd0] sm:$0xff] }
 0x4d8   : > { %3761 = vmatprep.subr.bf16.mxu0 %v3760_v61  ;;  %v3788_v40 = vpack.c.bf16 %v2734_v56, %v2733_v17  ;;  %v2717_v61 = vld [vmem:[%s4165_s19 + $0x50] sm:$0xff] }
 0x4d9   : > { %v3790_v32 = vpack.c.bf16 %v2718_v2, %v2717_v61 }
 0x4db   : > { %3763 = vmatpush1.bf16.msra.mxu0 %v3762_v3  ;;  %v2735_v3 = vld [vmem:[%s4165_s19 + $0xe0] sm:$0xff] }
 0x4dc   : > { %3765 = vmatprep.subr.bf16.mxu0 %v3764_v7  ;;  %v3792_v42 = vpack.c.bf16 %v2736_v10, %v2735_v3  ;;  %v2719_v7 = vld [vmem:[%s4165_s19 + $0x60] sm:$0xff] }
 0x4dd   : > { %v3794_v38 = vpack.c.bf16 %v2720_v34, %v2719_v7  ;;  %v2882_v34 = vld [vmem:[%s5094_s20] sm:$0xff] (!%p3204_p5) }
 0x4df   : > { %3767 = vmatpush1.bf16.msra.mxu0 %v3766_v53  ;;  %v2737_v53 = vld [vmem:[%s4165_s19 + $0xf0] sm:$0xff] }
 0x5a5   : > { %v3556_v5 = vpop.f32.mrb[4].mxu0 }
 0x5a6   : > { %v2527_v11 = vadd.f32 %v3556_v5, %v3196_v29  ;;  %v2521_v14 = vpop.f32.mrb[5].mxu0 }
 0x5a7   : > { %v2522_v24 = vadd.f32 %v3196_v29, %v2521_v14  ;;  %v2712_v29 = vld [vmem:[%s4165_s19 + $0x28] sm:$0xff] }
 0x5a8   : > { %v4916_v36 = vadd.f32 %v3932_v33, %v2527_v11  ;;  %v3778_v5 = vpack.c.bf16 %v2712_v29, %v2711_v27 }
 0x5a9   : > { %v4918_v15 = vadd.f32 %v3933_v41, %v2522_v24 }
 0x5aa   : > { %v2537_v20 = vsel %vm1224_vm5, %v4916_v36, 0.0  ;;  %3779 = vmatpush3.bf16.msra.mxu1 %v3778_v5 }
 0x5ab   : > { %2538 = vadd.xlane.f32.xlu1 %v2537_v20  ;;  %v2534_v59 = vsel %vm1224_vm5, %v4918_v15, 0.0 }
 0x5ac   : > { %2535 = vadd.xlane.f32.xlu0 %v2534_v59 }
 0x638   : > { %v2539_v47 = vpop.xlane.xlu1 %2538 }
 0x639   : > { %v2541_v48 = vmul.f32 0.015625, %v2539_v47  ;;  %v2536_v50 = vpop.xlane.xlu0 %2535 }
 0x63a   : > { %v2540_v22 = vmul.f32 0.015625, %v2536_v50 }
 0x63b   : > { %v4925_v25 = vsub.f32 %v4916_v36, %v2541_v48  ;;  %v3199_v48 = vld [vmem:[%s5130_s27] ss:$0 sm:$0xff] }
 0x63c   : > { %v4928_v51 = vsub.f32 %v4918_v15, %v2540_v22 }
 0x63d   : > { %v2545_v1 = vmul.f32 %v4925_v25, %v4925_v25 }
 0x63e   : > { %v2544_v30 = vmul.f32 %v4928_v51, %v4928_v51 }
 0x63f   : > { %v2549_v62 = vsel %vm1224_vm5, %v2545_v1, 0.0  ;;  %v3200_v1 = vld [vmem:[%s5131_s6] ss:$0 sm:$0xff] }
 0x640   : > { %2550 = vadd.xlane.f32.xlu1 %v2549_v62  ;;  %v2546_v58 = vsel %vm1224_vm5, %v2544_v30, 0.0 }
 0x641   : > { %2547 = vadd.xlane.f32.xlu0 %v2546_v58 }
 0x6cd   : > { %v2551_v11 = vpop.xlane.xlu1 %2550 }
 0x6ce   : > { %v2553_v14 = vmul.f32 0.015625, %v2551_v11  ;;  %v2548_v24 = vpop.xlane.xlu0 %2547 }
 0x6cf   : > { %v2552_v33 = vmul.f32 0.015625, %v2548_v24 }
 0x6d0   : > { %v2555_v41 = vadd.f32 1e-06, %v2553_v14 }
 0x6d1   : > { %v2554_v20 = vadd.f32 1e-06, %v2552_v33 }
 0x6d2   : > { %3920 = vrsqrt.f32 %v2555_v41 }
 0x6d3   : > { %3922 = vrsqrt.f32 %v2554_v20 }
 0x6dc   : > { %v3921_v59 = vpop.eup %3920 }
 0x6dd   : > { %v3923_v47 = vpop.eup %3922  ;;  %v2559_v22 = vmul.f32 %v3921_v59, %v4925_v25  ;;  %v2730_v25 = vld [vmem:[%s4165_s19 + $0xb8] sm:$0xff] }
 0x6de   : > { %v2558_v50 = vmul.f32 %v3923_v47, %v4928_v51  ;;  %v2729_v51 = vld [vmem:[%s4165_s19 + $0xb0] sm:$0xff] }
 0x6df   : > { %v2567_v58 = vmul.f32 %v3199_v48, %v2559_v22  ;;  %v3780_v28 = vpack.c.bf16 %v2730_v25, %v2729_v51  ;;  %v3203_v25 = vld [vmem:[%s5132_s2] ss:$0 sm:$0xff] }
 0x6e0   : > { %v2566_v30 = vmul.f32 %v3199_v48, %v2558_v50 }
 0x6e1   : > { %v2575_v54 = vadd.f32 %v3200_v1, %v2567_v58  ;;  %3781 = vmatprep.subr.bf16.mxu1 %v3780_v28 }
 0x6e2   : > { %v2574_v62 = vadd.f32 %v3200_v1, %v2566_v30  ;;  %3783 = vmatpush3.bf16.msra.mxu1 %v3782_v45 }
 0x6e3   : > { %3785 = vmatprep.subr.bf16.mxu1 %v3784_v0 }
 0x6e4   : > { %3201 = vmatmul.mubr.msk.f32.vlgmr.msra.gmra.mrb[6].mxu0 %vm1224_vm5, %v2574_v62 }
 0x6e5   : > { %2680 = vmatprep.mubr.f32.mxu0 %v3977_v8  ;;  %v2738_v8 = vld [vmem:[%s4165_s19 + $0xf8] sm:$0xff] }
 0x6e6   : > { %3787 = vmatpush3.bf16.msra.mxu1 %v3786_v43  ;;  %v3796_v9 = vpack.c.bf16 %v2738_v8, %v2737_v53  ;;  %v2884_v53 = vld [vmem:[%s5094_s20 + $0x10] sm:$0xff] (!%p3204_p5)  ;;  %v3978_v8 = vmov (!%p3204_p5), 0.0|0.0  }
 0x6e7   : > { %3789 = vmatprep.subr.bf16.mxu1 %v3788_v40  ;;  %3800 = vmatprep.subr.bf16.mxu0 (!%p3204_p5), %v3978_v8 }
 0x6e8   : > { %3202 = vmatmul.mubr.msk.f32.gmra.mrb[8].mxu0 %vm1224_vm5, %v2575_v54 }
 0x6e9   : > { %3573 = vmatprep.mubr.msk.f32.mxu0 (!%p3204_p5), %vm3979_vm15, %v3980_v46 }
 0x6ea   : > { %3791 = vmatpush3.bf16.msra.mxu1 %v3790_v32 }
 0x6eb   : > { %3793 = vmatprep.subr.bf16.mxu1 %v3792_v42 }
 0x6ee   : > { %3795 = vmatpush3.bf16.msra.mxu1 %v3794_v38  ;;  %v2883_v38 = vld [vmem:[%s5094_s20 + $0x8] sm:$0xff] (!%p3204_p5) }
 0x6ef   : > { %3797 = vmatprep.subr.bf16.mxu1 %v3796_v9  ;;  %v3801_v9 = vpack.c.bf16 (!%p3204_p5), %v2883_v38, %v2882_v34 }
 0x6f1   : > { %3802 = vmatpush3.bf16.msra.mxu0 (!%p3204_p5), %v3801_v9 }
 0x6f2   : > { %3799 = vmatpush3.bf16.msra.mxu1 %v3798_v13  ;;  %v3804_v13 = vpack.c.bf16 (!%p3204_p5), %v2885_v12, %v2884_v53  ;;  %3803 = vmatprep.subr.bf16.mxu0 (!%p3204_p5), %v3978_v8 }
 0x6f5   : > { %3805 = vmatpush3.bf16.msra.mxu0 (!%p3204_p5), %v3804_v13 }
 0x6f6   : > { %3806 = vmatprep.subr.bf16.mxu0 (!%p3204_p5), %v3978_v8 }
 0x7b7   : > { %v2676_v19 = vpop.f32.mrb[6].mxu0 }
 0x7b8   : > { %v2677_v31 = vadd.f32 %v2676_v19, %v2597_v37  ;;  %v2678_v18 = vpop.f32.mrb[7].mxu0  ;;  %v2889_v19 = vld [vmem:[%s5094_s20 + $0x38] sm:$0xff] (!%p3204_p5) }
 0x7b9   : > { %v2679_v6 = vadd.f32 %v2678_v18, %v2601_v44 }
 0x7ba   : > { %v2691_v23 = vmul.f32 0.70710677, %v2677_v31  ;;  %v2687_v20 = vmul.f32 0.5, %v2677_v31 }
 0x7bb   : > { %v2692_v57 = vmul.f32 0.70710677, %v2679_v6  ;;  %v2682_v26 = vpop.f32.mrb[8].mxu0  ;;  %v2688_v33 = vmul.f32 0.5, %v2679_v6 }
 0x7bc   : > { %3924 = verf.f32 %v2691_v23  ;;  %v2683_v27 = vadd.f32 %v2682_v26, %v2597_v37  ;;  %v2684_v29 = vpop.f32.mrb[9].mxu0  ;;  %v3807_v37 = vpack.c.bf16 (!%p3204_p5), %v2887_v4, %v2886_v16 }
 0x7bd   : > { %3926 = verf.f32 %v2692_v57  ;;  %v2685_v5 = vadd.f32 %v2684_v29, %v2601_v44  ;;  %v2888_v44 = vld [vmem:[%s5094_s20 + $0x30] sm:$0xff] (!%p3204_p5)  ;;  %v3205_v29 = vld [vmem:[%s5133_s22] ss:$0 sm:$0xff] (!%p3204_p5) }
 0x7be   : > { %v2693_v11 = vmul.f32 0.70710677, %v2683_v27  ;;  %v2689_v62 = vmul.f32 0.5, %v2683_v27  ;;  %3808 = vmatpush3.bf16.msra.mxu0 (!%p3204_p5), %v3807_v37  ;;  %v3810_v31 = vpack.c.bf16 (!%p3204_p5), %v2889_v19, %v2888_v44 }
 0x7bf   : > { %v2694_v14 = vmul.f32 0.70710677, %v2685_v5  ;;  %v2690_v1 = vmul.f32 0.5, %v2685_v5  ;;  %3809 = vmatprep.subr.bf16.mxu0 (!%p3204_p5), %v3978_v8 }
 0x7c0   : > { %3928 = verf.f32 %v2693_v11 }
 0x7c1   : > { %3930 = verf.f32 %v2694_v14 }
 0x7c2   : > { %3811 = vmatpush3.bf16.msra.mxu0 (!%p3204_p5), %v3810_v31 }
 0x7c6   : > { %v3925_v21 = vpop.eup %3924 }
 0x7c7   : > { %v3927_v24 = vpop.eup %3926  ;;  %v2699_v35 = vadd.f32 1.0, %v3925_v21  ;;  %v3206_v21 = vld [vmem:[%s5134_s30] ss:$0 sm:$0xff] (!%p3204_p5) }
 0x7c8   : > { %v2700_v41 = vadd.f32 1.0, %v3927_v24 }
 0x7c9   : > { %v2703_v50 = vmul.f32 %v2699_v35, %v2687_v20  ;;  %v3207_v20 = vld [vmem:[%s5135_s18] ss:$0 sm:$0xff] (!%p3204_p5) }
 0x7ca   : > { %v3929_v59 = vpop.eup %3928  ;;  %v2704_v47 = vmul.f32 %v2700_v41, %v2688_v33 }
 0x7cb   : > { %v3931_v48 = vpop.eup %3930  ;;  %v2701_v22 = vadd.f32 1.0, %v3929_v59 }
 0x7cc   : > { %v2702_v30 = vadd.f32 1.0, %v3931_v48  ;;  %2810 = vmatprep.mubr.f32.mxu1 %v2704_v47 }
 0x7cd   : > { %2811 = vmatmul.mubr.f32.vlgmr.msra.gmra.mrb[18].mxu1 %v2703_v50  ;;  %v2705_v54 = vmul.f32 %v2701_v22, %v2689_v62 }
 0x7ce   : > { %v2706_v58 = vmul.f32 %v2702_v30, %v2690_v1 }
 0x7d0   : > { %2815 = vmatprep.mubr.f32.mxu1 %v2706_v58 }
 0x7d1   : > { %2816 = vmatmul.mubr.f32.gmra.mrb[20].mxu1 %v2705_v54 }
 0x8a0   : > { %v3426_v51 = vpop.f32.mrb[18].mxu1 }
 0x8a1   : > { %v3427_v28 = vpop.f32.mrb[19].mxu1 }
 0x8a2   : > { %v3428_v60 = vadd.f32 %v3427_v28, %v3426_v51 }
 0x8a4   : > { %v2813_v39 = vadd.f32 %v3428_v60, %v3203_v25  ;;  %v3429_v45 = vpop.f32.mrb[20].mxu1 }
 0x8a5   : > { %v3430_v63 = vpop.f32.mrb[21].mxu1 }
 0x8a6   : > { %v2821_v49 = vadd.f32 %v2813_v39, %v4918_v15  ;;  %v3431_v0 = vadd.f32 %v3430_v63, %v3429_v45  ;;  %2828 = sbr.rel (%p3204_p5) target bundleno = 2761 (0xac9), region = 116 }
 0x8a8   : > { %2823 = vst.msk [vmem:[#allocation2] sm:$0xff] %vm1224_vm5, %v2821_v49  ;;  %v2818_v55 = vadd.f32 %v3431_v0, %v3203_v25 }
 0x8aa   : > { %v2822_v52 = vadd.f32 %v2818_v55, %v4916_v36 }
 0x8ac   : > { %2824 = vst.msk [vmem:[#allocation2 + $0x8] sm:$0xff] %vm1224_vm5, %v2822_v52  ;;  %v2833_v43 = vrot.slane (!%p3204_p5), %v2822_v52, 7 }
 0x8ae   : > { %v2834_v17 = vsel %vm2430_vm7, %v2833_v43, %v2821_v49 }
 0x8af   : > { %v2837_v56 = vsel %vm2836_vm14, %v2834_v17, 0.0 }
 0x8b0   : > { %2838 = vadd.xlane.f32.xlu0 %v2837_v56 }
 0x93d   : > { %v2839_v40 = vpop.xlane.xlu0 %2838 }
 0x93e   : > { %v2840_v61 = vmul.f32 0.015625, %v2839_v40 }
 0x940   : > { %v2842_v15 = vrot.slane %v2840_v61, 1  ;;  %v2845_v2 = vsub.f32 %v2821_v49, %v2840_v61 }
 0x942   : > { %v2846_v32 = vsub.f32 %v2822_v52, %v2842_v15  ;;  %v2847_v10 = vmul.f32 %v2845_v2, %v2845_v2 }
 0x944   : > { %v2848_v3 = vmul.f32 %v2846_v32, %v2846_v32 }
 0x946   : > { %v2851_v42 = vrot.slane %v2848_v3, 7 }
 0x948   : > { %v2852_v36 = vsel %vm2430_vm7, %v2851_v42, %v2847_v10 }
 0x949   : > { %v2854_v7 = vsel %vm2836_vm14, %v2852_v36, 0.0 }
 0x94a   : > { %2855 = vadd.xlane.f32.xlu0 %v2854_v7 }
 0x9d7   : > { %v2856_v18 = vpop.xlane.xlu0 %2855 }
 0x9d8   : > { %v2857_v6 = vmul.f32 0.015625, %v2856_v18 }
 0x9da   : > { %v2858_v23 = vadd.f32 1e-06, %v2857_v6 }
 0x9dc   : > { %3934 = vrsqrt.f32 %v2858_v23 }
 0x9e6   : > { %v3935_v57 = vpop.eup %3934 }
 0x9e7   : > { %v2861_v26 = vrot.slane %v3935_v57, 1  ;;  %v2864_v27 = vmul.f32 %v3935_v57, %v2845_v2 }
 0x9e9   : > { %v2865_v5 = vmul.f32 %v2861_v26, %v2846_v32  ;;  %v2872_v11 = vmul.f32 %v3205_v29, %v2864_v27 }
 0x9eb   : > { %v2873_v14 = vmul.f32 %v3205_v29, %v2865_v5  ;;  %v2880_v35 = vadd.f32 %v3206_v21, %v2872_v11 }
 0x9ed   : > { %v2881_v24 = vadd.f32 %v3206_v21, %v2873_v14 }
 0x9ef   : > { %v2899_v33 = vrot.slane %v2881_v24, 7 }
 0x9f1   : > { %v2900_v41 = vsel %vm2430_vm7, %v2899_v33, %v2880_v35 }
 0x9f2   : > { %3574 = vmatmul.mubr.msk.f32.vlgmr.msra.gmra.mrb[0].mxu0 %vm1224_vm5, %v2900_v41 }
 0xac5   : > { %v2969_v59 = vpop.f32.mrb[0].mxu0 }
 0xac6   : > { %v2970_v47 = vadd.f32 %v3207_v20, %v2969_v59  ;;  %v3575_v48 = vpop.f32.mrb[1].mxu0 }
 0xac8   : > { %2973 = vst [vmem:[#allocation3] sm:$0x3] %v2970_v47 }
 0xac9 PF: > { %p3834_p6 = scmp.eq.s32.totalorder %s4103_s28, 1  ;;  %s3981_s27 = smov [#allocation3]  }
 0xaca   : > { %s2981_s10 = sshll.u32 %s3981_s27, 4  ;;  %s2982_s10 = int_to_ptr.vmem [resolvable:$true] %s2981_s10 }
 0xacb   : > { %s3936_s3 = scalar_lea.vmem %s2982_s10, 32  ;;  %p3943_p10 = scmp.lt.s32.totalorder %s2982_s10, %s2982_s10 }
 0xacc   : > { %p3937_p7 = scmp.ne.s32.totalorder %s2982_s10, %s3936_s3  ;;  %p3944_p11 = scmp.lt.s32.totalorder %s3936_s3, %s3936_s3 }
 0xace   : > { %p3938_p8 = pnand %p3937_p7, %p3834_p6  ;;  %p3945_p12 = por %p3944_p11, %p3943_p10 }
 0xad0   : > { %p3939_p9 = pneg %p3938_p8 }
 0xad2   : > { %p3946_p13 = pnand %p3945_p12, %p3939_p9 }
 0xad4   : > { %3949 = shalt.err (!%p3946_p13)
}
 0xad5   : > { %s5136_s19 = sld [smem:[#allocation19_spill]] }
 0xadb   : > { %s3950_s2 = scalar_lea.hbm %s5136_s19, 32 }
 0xadc   : > { %p3951_p0 = scmp.ne.s32.totalorder %s5136_s19, %s3950_s2  ;;  %p3956_p3 = scmp.lt.u32.totalorder %s3950_s2, %s5136_s19 }
 0xade   : > { %p3952_p1 = pnand %p3951_p0, %p3834_p6 }
 0xae0   : > { %p3953_p2 = pneg %p3952_p1 }
 0xae2   : > { %p3958_p4 = pnand %p3956_p3, %p3953_p2 }
 0xae4   : > { %3961 = shalt.err (!%p3958_p4)
}
 0xae5   : > { %3831 = dma.vmem_to_hbm [thread:$0]  (%p3834_p6), %s2982_s10, 32, %s5136_s19, [#allocation4]  }
 0xae6   : > { %3967 = dma.done.wait (%p3834_p6), [#allocation4], 32  }
 0xae7   : > { %3969 = vsyncadd (%p3834_p6), [#allocation4], 4294967264 }
 0xae8 PF: > { %s5137_s5 = sld [smem:[#allocation6_spill]] }
 0xaee   : > { %s33_s3 = sadd.s32 1, %s5137_s5  }
 0xaef   : > { %p30_p5 = scmp.ge.s32.totalorder %s33_s3, 4  }
 0xaf1   :  { %32 = sbr.rel (!%p30_p5) target bundleno = 15 (0xf), region = 180 }
 0xaf8   :  { %2994 = vsyncpa [#allocation4], 1 }
 0xaf9   :  { %2996 = vsyncpa [#allocation4 + $0x1], 1 }

</bundles_post_ra>
